<compile_context>
chip_gen: v6e
topology: v6e:2x2x1
jax: 0.10.0
libtpu: 0.0.40
codegen_flags: <defaults>
</compile_context>

<pallas_src>
import jax
import jax.numpy as jnp
from jax import lax
from jax.experimental import pallas as pl
from jax.experimental.pallas import tpu as pltpu
import numpy as np

LANE = 128
SUBLANE = 8


def _round_up(x, m):
    return (x + m - 1) // m * m


def proto_kernel(support_ref, weights_ref, query_ref, logits_ref, proto_ref, proto_sc):
    # support_ref : [WS_pad, C_pad]  support features (zero padded)
    # weights_ref : [W_pad,  WS_pad] per-class membership weights (one-hot / count)
    # query_ref   : [TQ,     C_pad]  query tile
    # logits_ref  : [TQ,     W_pad]  -squared-euclidean distance to each prototype
    # proto_ref   : [W_pad,  C_pad]  class centroids (NearestCentroid.centroids_)
    # proto_sc    : VMEM scratch holding centroids, resident across query tiles

    # Centroids computed once (first query tile), kept resident in VMEM scratch.
    @pl.when(pl.program_id(0) == 0)
    def _():
        support = support_ref[...]
        support = jnp.where(jnp.isfinite(support), support, 0.0)  # sanitize
        proto = jnp.dot(weights_ref[...], support,
                        preferred_element_type=jnp.float32,
                        precision=lax.Precision.HIGHEST)          # [W_pad, C_pad]
        proto_sc[...] = proto
        proto_ref[...] = proto

    query = query_ref[...]
    query = jnp.where(jnp.isfinite(query), query, 0.0)             # sanitize
    proto = proto_sc[...]

    # -||q - p||^2 = 2 q.p - ||q||^2 - ||p||^2 ; cross term on the MXU.
    cross = lax.dot_general(query, proto, (((1,), (1,)), ((), ())),
                            preferred_element_type=jnp.float32,
                            precision=lax.Precision.HIGHEST)       # [TQ, W_pad]
    q_norm = jnp.sum(query * query, axis=-1, keepdims=True)        # [TQ, 1]
    ones_row = jnp.ones((1, proto.shape[1]), dtype=jnp.float32)
    p_norm = lax.dot_general(ones_row, proto * proto, (((1,), (1,)), ((), ())),
                             preferred_element_type=jnp.float32,
                             precision=lax.Precision.HIGHEST)      # [1, W_pad]
    logits_ref[...] = 2.0 * cross - q_norm - p_norm


def proto_layer_forward(query_feat, support_feat, support_target, way_num):
    """query_feat: [1, WQ, C], support_feat: [1, WS, C], support_target: [1, WS] int."""
    q = jnp.squeeze(query_feat, axis=0).astype(jnp.float32)        # [WQ, C]
    s = jnp.squeeze(support_feat, axis=0).astype(jnp.float32)      # [WS, C]
    t = jnp.squeeze(support_target, axis=0).astype(jnp.int32)      # [WS]

    WS, C = s.shape
    WQ = q.shape[0]
    W = way_num

    # Padded, lane/sublane-aligned shapes. Zero padding is free correctness-wise
    # for both the weighted mean and the squared distance.
    C_pad = _round_up(C, LANE)
    W_pad = _round_up(W, LANE)             # lane-dense logits output
    WS_pad = _round_up(WS, SUBLANE)
    q_tile = min(LANE, _round_up(WQ, SUBLANE))
    WQ_pad = _round_up(WQ, q_tile)

    # Fold 1/count into the one-hot weights so the kernel does a single matmul.
    onehot = jax.nn.one_hot(t, W, dtype=jnp.float32)               # [WS, W]
    counts = jnp.sum(onehot, axis=0)                               # [W]
    weights = (onehot / jnp.maximum(counts, 1.0)[None, :]).T       # [W, WS]

    s_p = jnp.zeros((WS_pad, C_pad), jnp.float32).at[:WS, :C].set(s)
    q_p = jnp.zeros((WQ_pad, C_pad), jnp.float32).at[:WQ, :C].set(q)
    w_p = jnp.zeros((W_pad, WS_pad), jnp.float32).at[:W, :WS].set(weights)

    logits_p, proto_p = pl.pallas_call(
        proto_kernel,
        grid=(WQ_pad // q_tile,),
        in_specs=[
            pl.BlockSpec((WS_pad, C_pad), lambda i: (0, 0)),   # support (resident)
            pl.BlockSpec((W_pad, WS_pad), lambda i: (0, 0)),   # weights (resident)
            pl.BlockSpec((q_tile, C_pad), lambda i: (i, 0)),   # query tile
        ],
        out_specs=(
            pl.BlockSpec((q_tile, W_pad), lambda i: (i, 0)),   # logits tile
            pl.BlockSpec((W_pad, C_pad), lambda i: (0, 0)),    # centroids (resident)
        ),
        out_shape=(
            jax.ShapeDtypeStruct((WQ_pad, W_pad), jnp.float32),
            jax.ShapeDtypeStruct((W_pad, C_pad), jnp.float32),
        ),
        scratch_shapes=[pltpu.VMEM((W_pad, C_pad), jnp.float32)],
        compiler_params=pltpu.CompilerParams(
            dimension_semantics=("arbitrary",)),
    )(s_p, w_p, q_p)

    return logits_p[:WQ, :W], proto_p[:W, :C]


def _reference(query_feat, support_feat, support_target, way_num):
    q = np.array(jnp.squeeze(query_feat, 0), dtype=np.float32)
    s = np.array(jnp.squeeze(support_feat, 0), dtype=np.float32)
    t = np.array(jnp.squeeze(support_target, 0))
    s = np.where(np.isfinite(s), s, 0.0).astype(np.float32)
    q = np.where(np.isfinite(q), q, 0.0).astype(np.float32)
    W = way_num
    centroids = np.stack([s[t == w].mean(axis=0) for w in range(W)], axis=0)
    diff = q[:, None, :] - centroids[None, :, :]
    logits = -(diff ** 2).sum(-1)
    return logits, centroids


if __name__ == "__main__":
    way_num, shot_num, query_num, C = 5, 2, 3, 32
    WS = way_num * shot_num       # 10 support samples
    WQ = way_num * query_num      # 15 query samples

    key = jax.random.PRNGKey(0)
    k1, k2 = jax.random.split(key)
    support_feat = jax.random.normal(k1, (1, WS, C), dtype=jnp.float32)
    query_feat = jax.random.normal(k2, (1, WQ, C), dtype=jnp.float32)
    # inject a couple of non-finite values to exercise the sanitize path
    support_feat = support_feat.at[0, 0, 3].set(jnp.nan)
    query_feat = query_feat.at[0, 1, 7].set(jnp.inf)
    support_target = jnp.repeat(jnp.arange(way_num, dtype=jnp.int32), shot_num)[None, :]

    logits, centroids = proto_layer_forward(
        query_feat, support_feat, support_target, way_num)
    jax.block_until_ready((logits, centroids))

    ref_logits, ref_centroids = _reference(
        query_feat, support_feat, support_target, way_num)
    assert np.allclose(np.asarray(logits), ref_logits, atol=1e-3, rtol=1e-3)
    assert np.allclose(np.asarray(centroids), ref_centroids, atol=1e-5, rtol=1e-5)

    print("KERNEL_OK")
</pallas_src>

<mosaic_0001>
module attributes {stable_mosaic.version = 11 : i64} {
  func.func @proto_kernel(%arg0: i32, %arg1: memref<16x128xf32, #tpu.memory_space<vmem>>, %arg2: memref<128x16xf32, #tpu.memory_space<vmem>>, %arg3: memref<16x128xf32, #tpu.memory_space<vmem>>, %arg4: memref<16x128xf32, #tpu.memory_space<vmem>>, %arg5: memref<128x128xf32, #tpu.memory_space<vmem>>, %arg6: memref<128x128xf32, #tpu.memory_space<vmem>>) attributes {dimension_semantics = [#tpu.dimension_semantics<arbitrary>], iteration_bounds = array<i64: 1>, scalar_prefetch = 0 : i64, scratch_operands = 1 : i64, tpu.core_type = #tpu.core_type<tc>, window_params = [{pipeline_mode = #tpu.pipeline_mode<synchronous>, transform_indices = @transform_0, window_bounds = array<i64: 16, 128>}, {pipeline_mode = #tpu.pipeline_mode<synchronous>, transform_indices = @transform_1, window_bounds = array<i64: 128, 16>}, {transform_indices = @transform_2, window_bounds = array<i64: 16, 128>}, {transform_indices = @transform_3, window_bounds = array<i64: 16, 128>}, {pipeline_mode = #tpu.pipeline_mode<synchronous>, transform_indices = @transform_4, window_bounds = array<i64: 128, 128>}]} {
    %c0_i32 = arith.constant 0 : i32
    %0 = arith.cmpi eq, %arg0, %c0_i32 : i32
    %1 = arith.extui %0 : i1 to i32
    %c0_i32_0 = arith.constant 0 : i32
    %2 = arith.cmpi ne, %1, %c0_i32_0 : i32
    scf.if %2 {
      %c0_12 = arith.constant 0 : index
      %c0_13 = arith.constant 0 : index
      %23 = vector.load %arg1[%c0_12, %c0_13] : memref<16x128xf32, #tpu.memory_space<vmem>>, vector<16x128xf32>
      %24 = tpu.weird %23 : vector<16x128xf32> -> vector<16x128xi1>
      %cst_14 = arith.constant dense<true> : vector<16x128xi1>
      %25 = arith.xori %24, %cst_14 : vector<16x128xi1>
      %cst_15 = arith.constant 0.000000e+00 : f32
      %26 = vector.broadcast %cst_15 : f32 to vector<16x128xf32>
      %27 = arith.select %25, %23, %26 : vector<16x128xi1>, vector<16x128xf32>
      %c0_16 = arith.constant 0 : index
      %c0_17 = arith.constant 0 : index
      %28 = vector.load %arg2[%c0_16, %c0_17] : memref<128x16xf32, #tpu.memory_space<vmem>>, vector<128x16xf32>
      %cst_18 = arith.constant dense<0.000000e+00> : vector<128x128xf32>
      %29 = tpu.matmul %28, %27, %cst_18 {dimension_numbers = #tpu.dot_dimension_numbers<[1], [0], [0], [1], [0, 0, 1, 1], [], []>, precision = #tpu.contract_precision<fp32>} : vector<128x16xf32>, vector<16x128xf32>, vector<128x128xf32> -> vector<128x128xf32>
      %c0_19 = arith.constant 0 : index
      %c0_20 = arith.constant 0 : index
      %30 = vector.load %arg6[%c0_19, %c0_20] : memref<128x128xf32, #tpu.memory_space<vmem>>, vector<128x128xf32>
      tpu.vector_store %arg6[%c0_19, %c0_20], %29 {strides = array<i32>} : memref<128x128xf32, #tpu.memory_space<vmem>>, vector<128x128xf32>,
      %c0_21 = arith.constant 0 : index
      %c0_22 = arith.constant 0 : index
      %31 = vector.load %arg5[%c0_21, %c0_22] : memref<128x128xf32, #tpu.memory_space<vmem>>, vector<128x128xf32>
      tpu.vector_store %arg5[%c0_21, %c0_22], %29 {strides = array<i32>} : memref<128x128xf32, #tpu.memory_space<vmem>>, vector<128x128xf32>,
    } else {
    }
    %c0 = arith.constant 0 : index
    %c0_1 = arith.constant 0 : index
    %3 = vector.load %arg3[%c0, %c0_1] : memref<16x128xf32, #tpu.memory_space<vmem>>, vector<16x128xf32>
    %4 = tpu.weird %3 : vector<16x128xf32> -> vector<16x128xi1>
    %cst = arith.constant dense<true> : vector<16x128xi1>
    %5 = arith.xori %4, %cst : vector<16x128xi1>
    %cst_2 = arith.constant 0.000000e+00 : f32
    %6 = vector.broadcast %cst_2 : f32 to vector<16x128xf32>
    %7 = arith.select %5, %3, %6 : vector<16x128xi1>, vector<16x128xf32>
    %c0_3 = arith.constant 0 : index
    %c0_4 = arith.constant 0 : index
    %8 = vector.load %arg6[%c0_3, %c0_4] : memref<128x128xf32, #tpu.memory_space<vmem>>, vector<128x128xf32>
    %cst_5 = arith.constant dense<0.000000e+00> : vector<16x128xf32>
    %9 = tpu.matmul %7, %8, %cst_5 {dimension_numbers = #tpu.dot_dimension_numbers<[1], [1], [0], [0], [0, 0, 1, 0], [], []>, precision = #tpu.contract_precision<fp32>} : vector<16x128xf32>, vector<128x128xf32>, vector<16x128xf32> -> vector<16x128xf32>
    %10 = arith.mulf %7, %7 : vector<16x128xf32>
    %cst_6 = arith.constant dense<0.000000e+00> : vector<16xf32>
    %11 = vector.multi_reduction <add>, %10, %cst_6 [1] : vector<16x128xf32> to vector<16xf32>
    %12 = vector.shape_cast %11 : vector<16xf32> to vector<16x1xf32>
    %cst_7 = arith.constant 1.000000e+00 : f32
    %13 = vector.broadcast %cst_7 : f32 to vector<1x128xf32>
    %14 = arith.mulf %8, %8 : vector<128x128xf32>
    %cst_8 = arith.constant dense<0.000000e+00> : vector<1x128xf32>
    %15 = tpu.matmul %13, %14, %cst_8 {dimension_numbers = #tpu.dot_dimension_numbers<[1], [1], [0], [0], [0, 0, 1, 0], [], []>, precision = #tpu.contract_precision<fp32>} : vector<1x128xf32>, vector<128x128xf32>, vector<1x128xf32> -> vector<1x128xf32>
    %cst_9 = arith.constant 2.000000e+00 : f32
    %16 = vector.broadcast %cst_9 : f32 to vector<16x128xf32>
    %17 = arith.mulf %16, %9 : vector<16x128xf32>
    %18 = vector.broadcast %12 : vector<16x1xf32> to vector<16x128xf32>
    %19 = arith.subf %17, %18 : vector<16x128xf32>
    %20 = vector.broadcast %15 : vector<1x128xf32> to vector<16x128xf32>
    %21 = arith.subf %19, %20 : vector<16x128xf32>
    %c0_10 = arith.constant 0 : index
    %c0_11 = arith.constant 0 : index
    %22 = vector.load %arg4[%c0_10, %c0_11] : memref<16x128xf32, #tpu.memory_space<vmem>>, vector<16x128xf32>
    tpu.vector_store %arg4[%c0_10, %c0_11], %21 {strides = array<i32>} : memref<16x128xf32, #tpu.memory_space<vmem>>, vector<16x128xf32>,
    return
  }
  func.func @transform_0(%arg0: i32) -> (i32, i32) {
    %c0_i32 = arith.constant 0 : i32
    %c0_i32_0 = arith.constant 0 : i32
    %c0_i32_1 = arith.constant 0 : i32
    return %c0_i32, %c0_i32_0 : i32, i32
  }
  func.func @transform_1(%arg0: i32) -> (i32, i32) {
    %c0_i32 = arith.constant 0 : i32
    %c0_i32_0 = arith.constant 0 : i32
    %c0_i32_1 = arith.constant 0 : i32
    return %c0_i32, %c0_i32_0 : i32, i32
  }
  func.func @transform_2(%arg0: i32) -> (i32, i32) {
    %c0_i32 = arith.constant 0 : i32
    %c0_i32_0 = arith.constant 0 : i32
    return %arg0, %c0_i32 : i32, i32
  }
  func.func @transform_3(%arg0: i32) -> (i32, i32) {
    %c0_i32 = arith.constant 0 : i32
    %c0_i32_0 = arith.constant 0 : i32
    return %arg0, %c0_i32 : i32, i32
  }
  func.func @transform_4(%arg0: i32) -> (i32, i32) {
    %c0_i32 = arith.constant 0 : i32
    %c0_i32_0 = arith.constant 0 : i32
    %c0_i32_1 = arith.constant 0 : i32
    return %c0_i32, %c0_i32_0 : i32, i32
  }
}

</mosaic_0001>

<bundles_post_ra>
// kernel: tpu_custom_call.1
= control target key start
LH: loop header
LB: loop body
LE: loop exit
PB: predicated region body
PF: predicated region fallthrough
CT: control target
= control target key end

     0   :  { %10 = vsyncpa [#allocation4], 0  ;;  %vm46_vm0 = vcmask 130048   ;;  %vm3592_vm3 = vmmov 1   ;;  %s4965_s0 = inlined_call_operand.vmem [shape: f32[16,128], index: 0, kind: input, shape index: {}]   ;;  %s4966_s1 = inlined_call_operand.vmem [shape: f32[128,16], index: 1, kind: input, shape index: {}]   ;;  %s4967_s2 = inlined_call_operand.vmem [shape: f32[16,128], index: 2, kind: input, shape index: {}]   ;;  %s4968_s3 = inlined_call_operand.hbm [shape: f32[16,128], index: 3, kind: output, shape index: {0}]   ;;  %s4969_s4 = inlined_call_operand.hbm [shape: f32[128,128], index: 4, kind: output, shape index: {1}]  }
   0x1   :  { %v23_v0 = vld [vmem:[%s4965_s0 + $0x8] sm:$0xff]  ;;  %v22_v1 = vld [vmem:[%s4965_s0] sm:$0xff]  ;;  %v32_v5 = vld [vmem:[%s4966_s1 + $0x10] sm:$0xff] }
   0x2   :  { %v30_v2 = vld [vmem:[%s4966_s1] sm:$0xff]  ;;  %vm25_vm1 = vweird.f32 %v23_v0  ;;  %vm24_vm2 = vweird.f32 %v22_v1  ;;  %v31_v4 = vld [vmem:[%s4966_s1 + $0x8] sm:$0xff]  ;;  %v33_v6 = vld [vmem:[%s4966_s1 + $0x18] sm:$0xff]  ;;  %v54_v9 = vsel %vm46_vm0, %v32_v5, 0 }
   0x3   :  { %v48_v3 = vsel %vm46_vm0, %v30_v2, 0  ;;  %vm27_vm4 = vmxor %vm25_vm1, %vm3592_vm3  ;;  %v51_v8 = vsel %vm46_vm0, %v31_v4, 0  ;;  %v57_v10 = vsel %vm46_vm0, %v33_v6, 0  ;;  %v34_v11 = vld [vmem:[%s4966_s1 + $0x20] sm:$0xff]  ;;  %v3656_v14 = vand.u32 4294901760, %v54_v9  ;;  %v35_v16 = vld [vmem:[%s4966_s1 + $0x28] sm:$0xff] }
   0x4   :  { %v3645_v7 = vand.u32 4294901760, %v48_v3  ;;  %v29_v12 = vsel %vm27_vm4, %v23_v0, 0.0  ;;  %vm26_vm5 = vmxor %vm24_vm2, %vm3592_vm3  ;;  %v3654_v13 = vand.u32 4294901760, %v51_v8  ;;  %v3658_v15 = vand.u32 4294901760, %v57_v10 }
   0x5   :  { %v3663_v17 = vand.u32 4294901760, %v29_v12  ;;  %v28_v18 = vsel %vm26_vm5, %v22_v1, 0.0  ;;  %v60_v20 = vsel %vm46_vm0, %v34_v11, 0  ;;  %v3676_v23 = vsub.f32 %v54_v9, %v3656_v14 }
   0x6   :  { %v3666_v19 = vsub.f32 %v48_v3, %v3645_v7  ;;  %2983 = vmatprep.mubr.f32.mxu1 %v3645_v7  ;;  %v3670_v21 = vand.u32 4294901760, %v28_v18  ;;  %v3673_v22 = vsub.f32 %v51_v8, %v3654_v13  ;;  %v3679_v24 = vsub.f32 %v57_v10, %v3658_v15 }
   0x7   :  { %2951 = vmatprep.subr.mxu0 %v3663_v17  ;;  %v352_v26 = vsub.f32 %v29_v12, %v3663_v17  ;;  %v3684_v27 = vand.u32 4294901760, %v60_v20  ;;  %v63_v28 = vsel %vm46_vm0, %v35_v16, 0  ;;  %v184_v30 = vand.u32 4294901760, %v3676_v23 }
   0x8   :  { %v164_v25 = vand.u32 4294901760, %v3666_v19  ;;  %2952 = vmatpush3.msra.mxu0 %v3663_v17  ;;  %v174_v29 = vand.u32 4294901760, %v3673_v22  ;;  %v3691_v31 = vsub.f32 %v28_v18, %v3670_v21  ;;  %v194_v32 = vand.u32 4294901760, %v3679_v24 }
   0x9   :  { %11 = vsyncpa [#allocation6], 0  ;;  %2953 = vmatprep.subr.mxu0 %v3670_v21  ;;  %v3698_v34 = vand.u32 4294901760, %v352_v26  ;;  %v3701_v35 = vsub.f32 %v60_v20, %v3684_v27  ;;  %v3703_v36 = vand.u32 4294901760, %v63_v28  ;;  %v185_v38 = vsub.f32 %v3676_v23, %v184_v30  ;;  %v36_v41 = vld [vmem:[%s4966_s1 + $0x30] sm:$0xff]  ;;  %v37_v46 = vld [vmem:[%s4966_s1 + $0x38] sm:$0xff] }
   0xa   :  { %v165_v33 = vsub.f32 %v3666_v19, %v164_v25  ;;  %2954 = vmatpush3.msra.mxu0 %v3670_v21  ;;  %v175_v37 = vsub.f32 %v3673_v22, %v174_v29  ;;  %v3713_v39 = vand.u32 4294901760, %v3691_v31  ;;  %v195_v40 = vsub.f32 %v3679_v24, %v194_v32  ;;  %v38_v47 = vld [vmem:[%s4966_s1 + $0x40] sm:$0xff]  ;;  %v39_v56 = vld [vmem:[%s4966_s1 + $0x48] sm:$0xff]  ;;  %v40_v57 = vld [vmem:[%s4966_s1 + $0x50] sm:$0xff] }
   0xb   :  { %v354_v43 = vsub.f32 %v352_v26, %v3698_v34  ;;  %3007 = vmatprep.subr.mxu0 %v352_v26  ;;  %v204_v44 = vand.u32 4294901760, %v3701_v35  ;;  %v3724_v45 = vsub.f32 %v63_v28, %v3703_v36  ;;  %v186_v49 = vand.u32 4294901760, %v185_v38  ;;  %v41_v58 = vld [vmem:[%s4966_s1 + $0x58] sm:$0xff]  ;;  %v42_v3 = vld [vmem:[%s4966_s1 + $0x60] sm:$0xff]  ;;  %v43_v16 = vld [vmem:[%s4966_s1 + $0x68] sm:$0xff] }
   0xc   :  { %v166_v42 = vand.u32 4294901760, %v165_v33  ;;  %v176_v48 = vand.u32 4294901760, %v175_v37  ;;  %v361_v50 = vsub.f32 %v3691_v31, %v3713_v39  ;;  %v196_v51 = vand.u32 4294901760, %v195_v40 }
   0xd   :  { %v355_v52 = vand.u32 4294901760, %v354_v43  ;;  %v205_v53 = vsub.f32 %v3701_v35, %v204_v44  ;;  %v214_v54 = vand.u32 4294901760, %v3724_v45  ;;  %v66_v55 = vsel %vm46_vm0, %v36_v41, 0 }
   0xe   :  { %2955 = vmatprep.mubr.f32.mxu0 %v166_v42  ;;  %v362_v59 = vand.u32 4294901760, %v361_v50  ;;  %v3748_v60 = vand.u32 4294901760, %v66_v55  ;;  %v69_v61 = vsel %vm46_vm0, %v37_v46, 0  ;;  %v72_v62 = vsel %vm46_vm0, %v38_v47, 0 }
   0xf   :  { %2956 = vmatmul.mubr.f32.vlgmr.msra.gmra.mxu0 %v176_v48  ;;  %2979 = vmatprep.subr.mxu1 %v355_v52  ;;  %v206_v63 = vand.u32 4294901760, %v205_v53  ;;  %v215_v0 = vsub.f32 %v3724_v45, %v214_v54  ;;  %v3755_v1 = vand.u32 4294901760, %v69_v61  ;;  %v3757_v2 = vand.u32 4294901760, %v72_v62 }
  0x10   :  { %2958 = vmatprep.mubr.f32.mxu0 %v186_v49  ;;  %2980 = vmatpush3.msra.mxu1 %v355_v52  ;;  %v3763_v4 = vsub.f32 %v66_v55, %v3748_v60  ;;  %v75_v5 = vsel %vm46_vm0, %v39_v56, 0  ;;  %v78_v6 = vsel %vm46_vm0, %v40_v57, 0  ;;  %v81_v8 = vsel %vm46_vm0, %v41_v58, 0 }
  0x11   :  { %3008 = vmatpush3.msra.mxu0 %v352_v26  ;;  %2981 = vmatprep.subr.mxu1 %v362_v59  ;;  %v216_v9 = vand.u32 4294901760, %v215_v0  ;;  %v3769_v10 = vsub.f32 %v69_v61, %v3755_v1  ;;  %v3772_v11 = vsub.f32 %v72_v62, %v3757_v2  ;;  %v3774_v12 = vand.u32 4294901760, %v75_v5 }
  0x12   :  { %3009 = vmatprep.subr.mxu0 %v3691_v31  ;;  %2982 = vmatpush3.msra.mxu1 %v362_v59  ;;  %v224_v18 = vand.u32 4294901760, %v3763_v4  ;;  %v3781_v20 = vand.u32 4294901760, %v78_v6  ;;  %v3783_v26 = vand.u32 4294901760, %v81_v8  ;;  %v84_v28 = vsel %vm46_vm0, %v42_v3, 0 }
  0x13   :  { %2959 = vmatmul.mubr.f32.gmra.mxu0 %v196_v51  ;;  %2984 = vmatmul.mubr.f32.vlgmr.msra.gmra.mxu1 %v3654_v13  ;;  %v234_v33 = vand.u32 4294901760, %v3769_v10  ;;  %v244_v37 = vand.u32 4294901760, %v3772_v11  ;;  %v3791_v38 = vsub.f32 %v75_v5, %v3774_v12  ;;  %v3793_v40 = vand.u32 4294901760, %v84_v28  ;;  %v44_v51 = vld [vmem:[%s4966_s1 + $0x70] sm:$0xff] }
  0x14   :  { %3035 = vmatprep.subr.mxu1 %v3663_v17  ;;  %2961 = vmatprep.mubr.f32.mxu0 %v206_v63  ;;  %v225_v41 = vsub.f32 %v3763_v4, %v224_v18  ;;  %v3800_v42 = vsub.f32 %v78_v6, %v3781_v20  ;;  %v3803_v43 = vsub.f32 %v81_v8, %v3783_v26  ;;  %v87_v46 = vsel %vm46_vm0, %v43_v16, 0 }
  0x15   :  { %3036 = vmatpush3.msra.mxu1 %v3663_v17  ;;  %2986 = vmatprep.mubr.f32.mxu1 %v3656_v14  ;;  %v235_v47 = vsub.f32 %v3769_v10, %v234_v33  ;;  %v245_v48 = vsub.f32 %v3772_v11, %v244_v37  ;;  %v254_v49 = vand.u32 4294901760, %v3791_v38  ;;  %v3816_v50 = vsub.f32 %v84_v28, %v3793_v40 }
  0x16   :  { %3010 = vmatpush3.msra.mxu0 %v3691_v31  ;;  %v226_v52 = vand.u32 4294901760, %v225_v41  ;;  %v264_v53 = vand.u32 4294901760, %v3800_v42  ;;  %v274_v55 = vand.u32 4294901760, %v3803_v43  ;;  %3037 = vmatprep.subr.mxu1 %v3670_v21  ;;  %v3824_v56 = vand.u32 4294901760, %v87_v46  ;;  %v45_v31 = vld [vmem:[%s4966_s1 + $0x78] sm:$0xff] }
  0x17   :  { %2962 = vmatmul.mubr.f32.gmra.mxu0 %v216_v9  ;;  %2987 = vmatmul.mubr.f32.gmra.mxu1 %v3658_v15  ;;  %v236_v57 = vand.u32 4294901760, %v235_v47  ;;  %v246_v58 = vand.u32 4294901760, %v245_v48  ;;  %v255_v59 = vsub.f32 %v3791_v38, %v254_v49  ;;  %v284_v61 = vand.u32 4294901760, %v3816_v50 }
  0x18   :  { %3063 = vmatprep.subr.mxu0 %v3698_v34  ;;  %2964 = vmatprep.mubr.f32.mxu0 %v226_v52  ;;  %v265_v62 = vsub.f32 %v3800_v42, %v264_v53  ;;  %v3840_v63 = vsub.f32 %v87_v46, %v3824_v56  ;;  %v90_v0 = vsel %vm46_vm0, %v44_v51, 0  ;;  %v93_v5 = vsel %vm46_vm0, %v45_v31, 0 }
  0x19   :  { %2989 = vmatprep.mubr.f32.mxu1 %v3684_v27  ;;  %3038 = vmatpush3.msra.mxu1 %v3670_v21  ;;  %v3844_v3 = vand.u32 4294901760, %v90_v0  ;;  %v256_v6 = vand.u32 4294901760, %v255_v59  ;;  %v275_v8 = vsub.f32 %v3803_v43, %v274_v55  ;;  %v3851_v16 = vand.u32 4294901760, %v93_v5 }
  0x1a   :  { %v294_v9 = vand.u32 4294901760, %v3840_v63  ;;  %3091 = vmatprep.subr.mxu1 %v3663_v17  ;;  %v266_v28 = vand.u32 4294901760, %v265_v62  ;;  %v285_v41 = vsub.f32 %v3816_v50, %v284_v61  ;;  %vm3594_vm10 = vmmov 0  }
  0x1b   :  { %2965 = vmatmul.mubr.f32.gmra.mxu0 %v236_v57  ;;  %2990 = vmatmul.mubr.f32.gmra.mxu1 %v3703_v36  ;;  %v3859_v46 = vsub.f32 %v90_v0, %v3844_v3  ;;  %v3863_v47 = vsub.f32 %v93_v5, %v3851_v16  ;;  %v276_v51 = vand.u32 4294901760, %v275_v8 }
  0x1c   :  { %2967 = vmatprep.mubr.f32.mxu0 %v246_v58  ;;  %2992 = vmatprep.mubr.f32.mxu1 %v3748_v60  ;;  %v295_v52 = vsub.f32 %v3840_v63, %v294_v9  ;;  %v286_v57 = vand.u32 4294901760, %v285_v41 }
  0x1d   :  { %v304_v48 = vand.u32 4294901760, %v3859_v46  ;;  %v314_v31 = vand.u32 4294901760, %v3863_v47 }
  0x1e   :  { %v296_v59 = vand.u32 4294901760, %v295_v52 }
  0x1f   :  { %2968 = vmatmul.mubr.f32.gmra.mxu0 %v256_v6  ;;  %2993 = vmatmul.mubr.f32.gmra.mxu1 %v3755_v1  ;;  %v305_v58 = vsub.f32 %v3859_v46, %v304_v48  ;;  %v315_v62 = vsub.f32 %v3863_v47, %v314_v31 }
  0x20   :  { %2970 = vmatprep.mubr.f32.mxu0 %v266_v28  ;;  %2995 = vmatprep.mubr.f32.mxu1 %v3757_v2 }
  0x21   :  { %v306_v0 = vand.u32 4294901760, %v305_v58  ;;  %v316_v5 = vand.u32 4294901760, %v315_v62 }
  0x23   :  { %2971 = vmatmul.mubr.f32.gmra.mxu0 %v276_v51  ;;  %2996 = vmatmul.mubr.f32.gmra.mxu1 %v3774_v12 }
  0x24   :  { %2973 = vmatprep.mubr.f32.mxu0 %v286_v57  ;;  %2998 = vmatprep.mubr.f32.mxu1 %v3781_v20 }
  0x27   :  { %2974 = vmatmul.mubr.f32.gmra.mxu0 %v296_v59  ;;  %2999 = vmatmul.mubr.f32.gmra.mxu1 %v3783_v26 }
  0x28   :  { %2976 = vmatprep.mubr.f32.mxu0 %v306_v0  ;;  %3001 = vmatprep.mubr.f32.mxu1 %v3793_v40 }
  0x2b   :  { %2977 = vmatmul.mubr.f32.gmra.mxu0 %v316_v5  ;;  %3002 = vmatmul.mubr.f32.gmra.mxu1 %v3824_v56 }
  0x2c   :  { %3011 = vmatprep.mubr.f32.mxu0 %v3666_v19  ;;  %3004 = vmatprep.mubr.f32.mxu1 %v3844_v3 }
  0x2f   :  { %3012 = vmatmul.mubr.f32.vlgmr.msra.gmra.mxu0 %v3673_v22  ;;  %3005 = vmatmul.mubr.f32.gmra.mxu1 %v3851_v16 }
  0x30   :  { %3014 = vmatprep.mubr.f32.mxu0 %v3676_v23  ;;  %3039 = vmatprep.mubr.f32.mxu1 %v164_v25 }
  0x31   :  { %3064 = vmatpush3.msra.mxu0 %v3698_v34 }
  0x32   :  { %3065 = vmatprep.subr.mxu0 %v3713_v39 }
  0x33   :  { %3015 = vmatmul.mubr.f32.gmra.mxu0 %v3679_v24  ;;  %3040 = vmatmul.mubr.f32.vlgmr.msra.gmra.mxu1 %v174_v29 }
  0x34   :  { %3017 = vmatprep.mubr.f32.mxu0 %v3701_v35  ;;  %3092 = vmatpush3.msra.mxu1 %v3663_v17 }
  0x35   :  { %3042 = vmatprep.mubr.f32.mxu1 %v184_v30  ;;  %3066 = vmatpush3.msra.mxu0 %v3713_v39 }
  0x36   :  { %3093 = vmatprep.subr.mxu1 %v3670_v21 }
  0x37   :  { %3018 = vmatmul.mubr.f32.gmra.mxu0 %v3724_v45  ;;  %3094 = vmatpush3.msra.mxu1 %v3670_v21 }
  0x38   :  { %3043 = vmatmul.mubr.f32.gmra.mxu1 %v194_v32  ;;  %3020 = vmatprep.mubr.f32.mxu0 %v3763_v4 }
  0x39   :  { %3045 = vmatprep.mubr.f32.mxu1 %v204_v44 }
  0x3b   :  { %3021 = vmatmul.mubr.f32.gmra.mxu0 %v3769_v10 }
  0x3c   :  { %3046 = vmatmul.mubr.f32.gmra.mxu1 %v214_v54  ;;  %3023 = vmatprep.mubr.f32.mxu0 %v3772_v11 }
  0x3d   :  { %3048 = vmatprep.mubr.f32.mxu1 %v224_v18 }
  0x3f   :  { %3024 = vmatmul.mubr.f32.gmra.mxu0 %v3791_v38 }
  0x40   :  { %3049 = vmatmul.mubr.f32.gmra.mxu1 %v234_v33  ;;  %3026 = vmatprep.mubr.f32.mxu0 %v3800_v42 }
  0x41   :  { %3051 = vmatprep.mubr.f32.mxu1 %v244_v37 }
  0x43   :  { %3027 = vmatmul.mubr.f32.gmra.mxu0 %v3803_v43 }
  0x44   :  { %3052 = vmatmul.mubr.f32.gmra.mxu1 %v254_v49  ;;  %3029 = vmatprep.mubr.f32.mxu0 %v3816_v50 }
  0x45   :  { %3054 = vmatprep.mubr.f32.mxu1 %v264_v53 }
  0x47   :  { %3030 = vmatmul.mubr.f32.gmra.mxu0 %v3840_v63 }
  0x48   :  { %3055 = vmatmul.mubr.f32.gmra.mxu1 %v274_v55  ;;  %3032 = vmatprep.mubr.f32.mxu0 %v3859_v46 }
  0x49   :  { %3057 = vmatprep.mubr.f32.mxu1 %v284_v61 }
  0x4b   :  { %3033 = vmatmul.mubr.f32.gmra.mxu0 %v3863_v47 }
  0x4c   :  { %3058 = vmatmul.mubr.f32.gmra.mxu1 %v294_v9  ;;  %3067 = vmatprep.mubr.f32.mxu0 %v3645_v7 }
  0x4d   :  { %3060 = vmatprep.mubr.f32.mxu1 %v304_v48 }
  0x4f   :  { %3068 = vmatmul.mubr.f32.vlgmr.msra.gmra.mxu0 %v3654_v13 }
  0x50   :  { %3061 = vmatmul.mubr.f32.gmra.mxu1 %v314_v31  ;;  %3070 = vmatprep.mubr.f32.mxu0 %v3656_v14 }
  0x51   :  { %3095 = vmatprep.mubr.f32.mxu1 %v3645_v7 }
  0x53   :  { %3071 = vmatmul.mubr.f32.gmra.mxu0 %v3658_v15 }
  0x54   :  { %3096 = vmatmul.mubr.f32.vlgmr.msra.gmra.mxu1 %v3654_v13  ;;  %3073 = vmatprep.mubr.f32.mxu0 %v3684_v27 }
  0x55   :  { %3098 = vmatprep.mubr.f32.mxu1 %v3656_v14 }
  0x57   :  { %3074 = vmatmul.mubr.f32.gmra.mxu0 %v3703_v36 }
  0x58   :  { %3099 = vmatmul.mubr.f32.gmra.mxu1 %v3658_v15  ;;  %3076 = vmatprep.mubr.f32.mxu0 %v3748_v60 }
  0x59   :  { %3101 = vmatprep.mubr.f32.mxu1 %v3684_v27 }
  0x5b   :  { %3077 = vmatmul.mubr.f32.gmra.mxu0 %v3755_v1 }
  0x5c   :  { %3102 = vmatmul.mubr.f32.gmra.mxu1 %v3703_v36  ;;  %3079 = vmatprep.mubr.f32.mxu0 %v3757_v2 }
  0x5d   :  { %3104 = vmatprep.mubr.f32.mxu1 %v3748_v60 }
  0x5f   :  { %3080 = vmatmul.mubr.f32.gmra.mxu0 %v3774_v12 }
  0x60   :  { %3105 = vmatmul.mubr.f32.gmra.mxu1 %v3755_v1  ;;  %3082 = vmatprep.mubr.f32.mxu0 %v3781_v20 }
  0x61   :  { %3107 = vmatprep.mubr.f32.mxu1 %v3757_v2  ;;  %v1231_v2 = vld [vmem:[%s4967_s2] sm:$0xff] }
  0x62   :  { %vm1233_vm6 = vweird.f32 %v1231_v2 }
  0x63   :  { %3083 = vmatmul.mubr.f32.gmra.mxu0 %v3783_v26  ;;  %vm1235_vm7 = vmxor %vm1233_vm6, %vm3592_vm3 }
  0x64   :  { %3108 = vmatmul.mubr.f32.gmra.mxu1 %v3774_v12  ;;  %3085 = vmatprep.mubr.f32.mxu0 %v3793_v40  ;;  %v4021_v12 = vsel %vm1235_vm7, %v1231_v2, 0.0 }
  0x65   :  { %3110 = vmatprep.mubr.f32.mxu1 %v3781_v20  ;;  %4987 = vst [vmem:[#allocation10_spill] sm:$0xff] %v4021_v12  ;;  %v4026_v20 = vand.u32 4294901760, %v4021_v12 }
  0x67   :  { %3086 = vmatmul.mubr.f32.gmra.mxu0 %v3824_v56  ;;  %4988 = vst [vmem:[#allocation11_spill] sm:$0xff] %v4026_v20  ;;  %v4034_v37 = vsub.f32 %v4021_v12, %v4026_v20 }
  0x68   :  { %3111 = vmatmul.mubr.f32.gmra.mxu1 %v3783_v26  ;;  %3088 = vmatprep.mubr.f32.mxu0 %v3844_v3 }
  0x69   :  { %3113 = vmatprep.mubr.f32.mxu1 %v3793_v40  ;;  %4990 = vst [vmem:[#allocation13_spill] sm:$0xff] %v4034_v37  ;;  %v4970_v42 = vand.u32 4294901760, %v4034_v37 }
  0x6b   :  { %3089 = vmatmul.mubr.f32.gmra.mxu0 %v3851_v16  ;;  %v1339_v50 = vsub.f32 %v4034_v37, %v4970_v42 }
  0x6c   :  { %3114 = vmatmul.mubr.f32.gmra.mxu1 %v3824_v56 }
  0x6d   :  { %3116 = vmatprep.mubr.f32.mxu1 %v3844_v3  ;;  %v1340_v56 = vand.u32 4294901760, %v1339_v50 }
  0x6f   :  { %3151 = vmatprep.mubr.f32.mxu0 %v1340_v56 }
  0x70   :  { %3117 = vmatmul.mubr.f32.gmra.mxu1 %v3851_v16 }
  0x71   :  { %3186 = vmatprep.mubr.f32.mxu1 %v4026_v20 }
  0xcf   :  { %v3963_v7 = vpop.f32.mrf.mxu0 }
  0xd1   :  { %v3965_v13 = vpop.f32.mrf.mxu0 }
  0xd3   :  { %v3967_v14 = vpop.f32.mrf.mxu0  ;;  %v3969_v15 = vpop.f32.mrf.mxu1 }
  0xd4   :  { %v406_v42 = vadd.f32 %v3969_v15, %v3963_v7 }
  0xd5   :  { %v3971_v17 = vpop.f32.mrf.mxu0  ;;  %v3973_v19 = vpop.f32.mrf.mxu1 }
  0xd6   :  { %v400_v37 = vadd.f32 %v3973_v19, %v3965_v13 }
  0xd7   :  { %v3975_v21 = vpop.f32.mrf.mxu0  ;;  %v3977_v22 = vpop.f32.mrf.mxu1 }
  0xd9   :  { %v3979_v23 = vpop.f32.mrf.mxu0  ;;  %v3981_v24 = vpop.f32.mrf.mxu1 }
  0xda   :  { %v412_v7 = vadd.f32 %v3981_v24, %v3971_v17 }
  0xdb   :  { %v3983_v25 = vpop.f32.mrf.mxu0  ;;  %v3985_v27 = vpop.f32.mrf.mxu1 }
  0xdc   :  { %v430_v13 = vadd.f32 %v3985_v27, %v3975_v21 }
  0xdd   :  { %v3987_v29 = vpop.f32.mrf.mxu0  ;;  %v3989_v30 = vpop.f32.mrf.mxu1 }
  0xdf   :  { %v3991_v32 = vpop.f32.mrf.mxu0  ;;  %v3993_v34 = vpop.f32.mrf.mxu1 }
  0xe0   :  { %v442_v21 = vadd.f32 %v3993_v34, %v3983_v25 }
  0xe1   :  { %v3995_v35 = vpop.f32.mrf.mxu0  ;;  %v3997_v36 = vpop.f32.mrf.mxu1 }
  0xe3   :  { %v3999_v39 = vpop.f32.mrf.mxu0  ;;  %v4001_v44 = vpop.f32.mrf.mxu1 }
  0xe4   :  { %v454_v34 = vadd.f32 %v4001_v44, %v3991_v32 }
  0xe5   :  { %v4003_v45 = vpop.f32.mrf.mxu0  ;;  %v4005_v54 = vpop.f32.mrf.mxu1 }
  0xe7   :  { %v4007_v60 = vpop.f32.mrf.mxu0  ;;  %v4009_v1 = vpop.f32.mrf.mxu1 }
  0xe9   :  { %v4014_v4 = vpop.f32.mrf.mxu0  ;;  %v4016_v10 = vpop.f32.mrf.mxu1 }
  0xeb   :  { %v4019_v11 = vpop.f32.mrf.mxu0  ;;  %v4023_v18 = vpop.f32.mrf.mxu1 }
  0xec   :  { %4986 = vst [vmem:[#allocation9_spill] sm:$0xff] %v4019_v11 }
  0xed   :  { %v4028_v26 = vpop.f32.mrf.mxu0  ;;  %v4030_v33 = vpop.f32.mrf.mxu1 }
  0xee   :  { %4989 = vst [vmem:[#allocation12_spill] sm:$0xff] %v4028_v26 }
  0xef   :  { %v3013_v38 = vpop.f32.mrf.mxu0  ;;  %v4037_v40 = vpop.f32.mrf.mxu1 }
  0xf0   :  { %4991 = vst [vmem:[#allocation14_spill] sm:$0xff] %v4037_v40 }
  0xf1   :  { %v565_v43 = vpop.f32.mrf.mxu0  ;;  %v4040_v49 = vpop.f32.mrf.mxu1 }
  0xf2   :  { %4992 = vst [vmem:[#allocation15_spill] sm:$0xff] %v4040_v49  ;;  %v573_v49 = vadd.f32 %v3013_v38, %v406_v42 }
  0xf3   :  { %v3016_v53 = vpop.f32.mrf.mxu0  ;;  %v3041_v55 = vpop.f32.mrf.mxu1 }
  0xf4   :  { %v754_v11 = vadd.f32 %v3041_v55, %v573_v49 }
  0xf5   :  { %v579_v61 = vpop.f32.mrf.mxu0  ;;  %v745_v63 = vpop.f32.mrf.mxu1 }
  0xf6   :  { %v580_v38 = vadd.f32 %v579_v61, %v412_v7 }
  0xf7   :  { %v3019_v3 = vpop.f32.mrf.mxu0 }
  0xf8   :  { %v3044_v6 = vpop.f32.mrf.mxu1  ;;  %v601_v49 = vadd.f32 %v3019_v3, %v430_v13 }
  0xf9   :  { %v593_v8 = vpop.f32.mrf.mxu0 }
  0xfa   :  { %v761_v9 = vpop.f32.mrf.mxu1 }
  0xfb   :  { %v3022_v16 = vpop.f32.mrf.mxu0  ;;  %v762_v17 = vadd.f32 %v761_v9, %v580_v38 }
  0xfc   :  { %v3047_v28 = vpop.f32.mrf.mxu1 }
  0xfd   :  { %v4045_v41 = vpop.f32.mrf.mxu0 }
  0xfe   :  { %v777_v46 = vpop.f32.mrf.mxu1 }
  0xff   :  { %v4047_v47 = vpop.f32.mrf.mxu0 }
 0x100   :  { %v4049_v48 = vpop.f32.mrf.mxu1 }
 0x101   :  { %v4051_v51 = vpop.f32.mrf.mxu0 }
 0x102   :  { %v4053_v52 = vpop.f32.mrf.mxu1 }
 0x103   :  { %v4055_v31 = vpop.f32.mrf.mxu0 }
 0x104   :  { %v4057_v57 = vpop.f32.mrf.mxu1 }
 0x105   :  { %v4059_v58 = vpop.f32.mrf.mxu0 }
 0x106   :  { %v4061_v59 = vpop.f32.mrf.mxu1 }
 0x107   :  { %v4063_v62 = vpop.f32.mrf.mxu0 }
 0x108   :  { %4993 = vst [vmem:[#allocation16_spill] sm:$0xff] %v4063_v62  ;;  %v4065_v0 = vpop.f32.mrf.mxu1 }
 0x109   :  { %v4067_v5 = vpop.f32.mrf.mxu0 }
 0x10a   :  { %4994 = vst [vmem:[#allocation17_spill] sm:$0xff] %v4067_v5  ;;  %v4069_v2 = vpop.f32.mrf.mxu1  ;;  %v418_v5 = vadd.f32 %v3977_v22, %v3967_v14 }
 0x10b   :  { %4995 = vst [vmem:[#allocation18_spill] sm:$0xff] %v4069_v2  ;;  %v4071_v50 = vpop.f32.mrf.mxu0 }
 0x10c   :  { %4996 = vst [vmem:[#allocation19_spill] sm:$0xff] %v4071_v50  ;;  %v4073_v56 = vpop.f32.mrf.mxu1  ;;  %v566_v50 = vadd.f32 %v565_v43, %v400_v37  ;;  %v587_v15 = vadd.f32 %v3016_v53, %v418_v5  ;;  %v424_v37 = vadd.f32 %v3989_v30, %v3979_v23  ;;  %v436_v30 = vadd.f32 %v3997_v36, %v3987_v29 }
 0x10d   :  { %4997 = vst [vmem:[#allocation20_spill] sm:$0xff] %v4073_v56  ;;  %v4077_v20 = vpop.f32.mrf.mxu0  ;;  %v629_v5 = vadd.f32 %v4047_v47, %v454_v34 }
 0x10e   :  { %4998 = vst [vmem:[#allocation21_spill] sm:$0xff] %v4077_v20  ;;  %v4079_v12 = vpop.f32.mrf.mxu1  ;;  %v746_v20 = vadd.f32 %v745_v63, %v566_v50  ;;  %v770_v42 = vadd.f32 %v3044_v6, %v587_v15  ;;  %v615_v63 = vadd.f32 %v3022_v16, %v442_v21  ;;  %v608_v9 = vadd.f32 %v4045_v41, %v436_v30  ;;  %v5013_v21 = vld [vmem:[#allocation14_spill] sm:$0xff] }
 0x10f   :  { %4999 = vst [vmem:[#allocation22_spill] sm:$0xff] %v4079_v12  ;;  %v3069_v26 = vpop.f32.mrf.mxu0  ;;  %v448_v16 = vadd.f32 %v4005_v54, %v3995_v35  ;;  %v818_v15 = vadd.f32 %v4057_v57, %v629_v5  ;;  %v478_v57 = vadd.f32 %v4023_v18, %v4007_v60 }
 0x110   :  { %v4083_v40 = vpop.f32.mrf.mxu1  ;;  %v949_v12 = vadd.f32 %v3069_v26, %v754_v11  ;;  %v794_v50 = vadd.f32 %v4053_v52, %v608_v9  ;;  %v460_v52 = vadd.f32 %v4016_v10, %v4003_v45 }
 0x111   :  { %5000 = vst [vmem:[#allocation23_spill] sm:$0xff] %v4083_v40  ;;  %v942_v56 = vpop.f32.mrf.mxu0  ;;  %v622_v7 = vadd.f32 %v4051_v51, %v448_v16 }
 0x112   :  { %v4087_v2 = vpop.f32.mrf.mxu1  ;;  %v943_v40 = vadd.f32 %v942_v56, %v746_v20  ;;  %v594_v20 = vadd.f32 %v593_v8, %v424_v37 }
 0x113   :  { %v3072_v62 = vpop.f32.mrf.mxu0  ;;  %v810_v38 = vadd.f32 %v4061_v59, %v622_v7  ;;  %v472_v59 = vadd.f32 %v4030_v33, %v4014_v4  ;;  %v5018_v34 = vld [vmem:[#allocation19_spill] sm:$0xff] }
 0x114   :  { %v3097_v19 = vpop.f32.mrf.mxu1  ;;  %v961_v24 = vadd.f32 %v3072_v62, %v770_v42 }
 0x115   :  { %v4093_v14 = vadd.f32 %v3097_v19, %v949_v12  ;;  %v954_v22 = vpop.f32.mrf.mxu0  ;;  %v786_v12 = vadd.f32 %v3047_v28, %v601_v49  ;;  %v802_v28 = vadd.f32 %v4049_v48, %v615_v63  ;;  %v466_v48 = vadd.f32 %v4009_v1, %v3999_v39  ;;  %v5009_v49 = vld [vmem:[#allocation16_spill] sm:$0xff]  ;;  %v5021_v5 = vld [vmem:[#allocation21_spill] sm:$0xff] }
 0x116   :  { %v1105_v43 = vpop.f32.mrf.mxu1  ;;  %v955_v53 = vadd.f32 %v954_v22, %v762_v17  ;;  %v636_v22 = vadd.f32 %v4059_v58, %v460_v52  ;;  %v657_v17 = vadd.f32 %v5009_v49, %v478_v57  ;;  %v5016_v63 = vld [vmem:[#allocation12_spill] sm:$0xff]  ;;  %v5019_v9 = vld [vmem:[#allocation22_spill] sm:$0xff] }
 0x117   :  { %5001 = vst [vmem:[#allocation24_spill] sm:$0xff] %v4093_v14  ;;  %1216 = vst [vmem:[#allocation5 + $0x8] sm:$0xff] %v4093_v14  ;;  %v4098_v11 = vadd.f32 %v1105_v43, %v943_v40  ;;  %v3075_v26 = vpop.f32.mrf.mxu0  ;;  %v778_v40 = vadd.f32 %v777_v46, %v594_v20  ;;  %v643_v19 = vadd.f32 %v4055_v31, %v466_v48 }
 0x118   :  { %v3100_v27 = vpop.f32.mrf.mxu1  ;;  %v973_v3 = vadd.f32 %v3075_v26, %v786_v12  ;;  %v5014_v12 = vld [vmem:[#allocation17_spill] sm:$0xff] }
 0x119   :  { %1215 = vst [vmem:[#allocation5] sm:$0xff] %v4098_v11  ;;  %v4103_v55 = vadd.f32 %v3100_v27, %v961_v24  ;;  %v966_v23 = vpop.f32.mrf.mxu0  ;;  %v834_v37 = vadd.f32 %v4065_v0, %v643_v19  ;;  %v5010_v24 = vld [vmem:[#allocation18_spill] sm:$0xff]  ;;  %v5012_v0 = vld [vmem:[#allocation9_spill] sm:$0xff] }
 0x11a   :  { %v1117_v61 = vpop.f32.mrf.mxu1  ;;  %v967_v62 = vadd.f32 %v966_v23, %v778_v40  ;;  %v826_v26 = vadd.f32 %v5010_v24, %v636_v22  ;;  %v490_v27 = vadd.f32 %v5013_v21, %v5012_v0  ;;  %v5015_v23 = vld [vmem:[#allocation20_spill] sm:$0xff]  ;;  %v5017_v40 = vld [vmem:[#allocation15_spill] sm:$0xff] }
 0x11b   :  { %5002 = vst [vmem:[#allocation25_spill] sm:$0xff] %v4103_v55  ;;  %1218 = vst [vmem:[#allocation5 + $0x18] sm:$0xff] %v4103_v55  ;;  %v4108_v6 = vadd.f32 %v1117_v61, %v955_v53  ;;  %v3078_v25 = vpop.f32.mrf.mxu0  ;;  %v650_v53 = vadd.f32 %v5014_v12, %v472_v59  ;;  %v850_v30 = vadd.f32 %v5015_v23, %v657_v17 }
 0x11c   :  { %v3103_v8 = vpop.f32.mrf.mxu1  ;;  %v985_v32 = vadd.f32 %v3078_v25, %v802_v28 }
 0x11d   :  { %5003 = vst [vmem:[#allocation26_spill] sm:$0xff] %v4108_v6  ;;  %1217 = vst [vmem:[#allocation5 + $0x10] sm:$0xff] %v4108_v6  ;;  %v4115_v29 = vadd.f32 %v3103_v8, %v973_v3  ;;  %v978_v36 = vpop.f32.mrf.mxu0  ;;  %v484_v3 = vadd.f32 %v5017_v40, %v5016_v63  ;;  %v671_v8 = vadd.f32 %v5018_v34, %v490_v27 }
 0x11e   :  { %v1129_v46 = vpop.f32.mrf.mxu1  ;;  %v979_v35 = vadd.f32 %v978_v36, %v794_v50  ;;  %v842_v28 = vadd.f32 %v5019_v9, %v650_v53 }
 0x11f   :  { %5004 = vst [vmem:[#allocation27_spill] sm:$0xff] %v4115_v29  ;;  %1220 = vst [vmem:[#allocation5 + $0x28] sm:$0xff] %v4115_v29  ;;  %v4122_v44 = vadd.f32 %v1129_v46, %v967_v62  ;;  %v3081_v41 = vpop.f32.mrf.mxu0  ;;  %v664_v50 = vadd.f32 %v5021_v5, %v484_v3 }
 0x120   :  { %v3106_v56 = vpop.f32.mrf.mxu1  ;;  %v997_v39 = vadd.f32 %v3081_v41, %v818_v15 }
 0x121   :  { %5005 = vst [vmem:[#allocation28_spill] sm:$0xff] %v4122_v44  ;;  %1219 = vst [vmem:[#allocation5 + $0x20] sm:$0xff] %v4122_v44  ;;  %v4129_v54 = vadd.f32 %v3106_v56, %v985_v32  ;;  %v990_v47 = vpop.f32.mrf.mxu0  ;;  %v5022_v32 = vld [vmem:[#allocation23_spill] sm:$0xff] }
 0x122   :  { %v1141_v13 = vpop.f32.mrf.mxu1  ;;  %v991_v45 = vadd.f32 %v990_v47, %v810_v38  ;;  %v866_v41 = vadd.f32 %v5022_v32, %v671_v8 }
 0x123   :  { %5006 = vst [vmem:[#allocation29_spill] sm:$0xff] %v4129_v54  ;;  %1222 = vst [vmem:[#allocation5 + $0x38] sm:$0xff] %v4129_v54  ;;  %v4136_v1 = vadd.f32 %v1141_v13, %v979_v35  ;;  %v3084_v51 = vpop.f32.mrf.mxu0  ;;  %v858_v35 = vadd.f32 %v4087_v2, %v664_v50  ;;  %v4274_v8 = vand.u32 4294901760, %v4129_v54 }
 0x124   :  { %v3109_v42 = vpop.f32.mrf.mxu1  ;;  %v1009_v60 = vadd.f32 %v3084_v51, %v834_v37 }
 0x125   :  { %5007 = vst [vmem:[#allocation30_spill] sm:$0xff] %v4136_v1  ;;  %1221 = vst [vmem:[#allocation5 + $0x30] sm:$0xff] %v4136_v1  ;;  %v4143_v10 = vadd.f32 %v3109_v42, %v997_v39  ;;  %v1002_v31 = vpop.f32.mrf.mxu0  ;;  %v4292_v5 = vand.u32 4294901760, %v4136_v1 }
 0x126   :  { %v1153_v43 = vpop.f32.mrf.mxu1  ;;  %v1003_v4 = vadd.f32 %v1002_v31, %v826_v26 }
 0x127   :  { %5008 = vst [vmem:[#allocation31_spill] sm:$0xff] %v4143_v10  ;;  %1224 = vst [vmem:[#allocation5 + $0x48] sm:$0xff] %v4143_v10  ;;  %v4150_v18 = vadd.f32 %v1153_v43, %v991_v45  ;;  %v3087_v58 = vpop.f32.mrf.mxu0  ;;  %v4246_v53 = vand.u32 4294901760, %v4143_v10 }
 0x128   :  { %v3112_v20 = vpop.f32.mrf.mxu1  ;;  %v1021_v62 = vadd.f32 %v3087_v58, %v850_v30 }
 0x129   :  { %5011 = vst [vmem:[#allocation16_spill] sm:$0xff] %v4150_v18  ;;  %1223 = vst [vmem:[#allocation5 + $0x40] sm:$0xff] %v4150_v18  ;;  %v4157_v33 = vadd.f32 %v3112_v20, %v1009_v60  ;;  %v1014_v61 = vpop.f32.mrf.mxu0  ;;  %v4261_v63 = vsub.f32 %v4143_v10, %v4246_v53  ;;  %v4264_v40 = vand.u32 4294901760, %v4150_v18 }
 0x12a   :  { %v1165_v25 = vpop.f32.mrf.mxu1  ;;  %v1015_v48 = vadd.f32 %v1014_v61, %v842_v28 }
 0x12b   :  { %1226 = vst [vmem:[#allocation5 + $0x58] sm:$0xff] %v4157_v33  ;;  %v4164_v36 = vadd.f32 %v1165_v25, %v1003_v4  ;;  %v3090_v16 = vpop.f32.mrf.mxu0  ;;  %v4213_v43 = vand.u32 4294901760, %v4157_v33  ;;  %v4278_v9 = vsub.f32 %v4150_v18, %v4264_v40 }
 0x12c   :  { %v3115_v46 = vpop.f32.mrf.mxu1  ;;  %v1033_v47 = vadd.f32 %v3090_v16, %v866_v41  ;;  %v4283_v16 = vand.u32 4294901760, %v4261_v63 }
 0x12d   :  { %5020 = vst [vmem:[#allocation18_spill] sm:$0xff] %v4164_v36  ;;  %1225 = vst [vmem:[#allocation5 + $0x50] sm:$0xff] %v4164_v36  ;;  %v4169_v56 = vadd.f32 %v3115_v46, %v1021_v62  ;;  %v1026_v7 = vpop.f32.mrf.mxu0  ;;  %v4233_v0 = vsub.f32 %v4157_v33, %v4213_v43  ;;  %v4236_v21 = vand.u32 4294901760, %v4164_v36  ;;  %v4289_v46 = vsub.f32 %v4129_v54, %v4274_v8 }
 0x12e   :  { %v1177_v15 = vpop.f32.mrf.mxu1  ;;  %v1027_v38 = vadd.f32 %v1026_v7, %v858_v35  ;;  %v1402_v32 = vsub.f32 %v4261_v63, %v4283_v16  ;;  %v4297_v41 = vand.u32 4294901760, %v4278_v9  ;;  %v4306_v7 = vsub.f32 %v4136_v1, %v4292_v5 }
 0x12f   :  { %1228 = vst [vmem:[#allocation5 + $0x68] sm:$0xff] %v4169_v56  ;;  %v4173_v52 = vadd.f32 %v1177_v15, %v1015_v48  ;;  %v4176_v19 = vand.u32 4294901760, %v4169_v56  ;;  %v4250_v23 = vsub.f32 %v4164_v36, %v4236_v21  ;;  %v4255_v61 = vand.u32 4294901760, %v4233_v0 }
 0x130   :  { %v3118_v13 = vpop.f32.mrf.mxu1  ;;  %v4302_v48 = vand.u32 4294901760, %v4115_v29  ;;  %v1403_v15 = vand.u32 4294901760, %v1402_v32  ;;  %v1409_v35 = vsub.f32 %v4278_v9, %v4297_v41 }
 0x131   :  { %1227 = vst [vmem:[#allocation5 + $0x60] sm:$0xff] %v4173_v52  ;;  %v4179_v39 = vadd.f32 %v3118_v13, %v1033_v47  ;;  %v4189_v42 = vsub.f32 %v4169_v56, %v4176_v19  ;;  %v4192_v22 = vand.u32 4294901760, %v4173_v52  ;;  %v1388_v25 = vsub.f32 %v4233_v0, %v4255_v61  ;;  %v1232_v13 = vld [vmem:[%s4967_s2 + $0x8] sm:$0xff]  ;;  %s3596_s2 = smov [#allocation5]  }
 0x132   :  { %v1189_v51 = vpop.f32.mrf.mxu1  ;;  %v4269_v34 = vand.u32 4294901760, %v4250_v23  ;;  %v4311_v47 = vand.u32 4294901760, %v4289_v46  ;;  %vm1234_vm8 = vweird.f32 %v1232_v13  ;;  %s2618_s0 = sshll.u32 %s3596_s2, 4  ;;  %s2619_s0 = int_to_ptr.vmem [resolvable:$true] %s2618_s0 }
 0x133   :  { %1230 = vst [vmem:[#allocation5 + $0x78] sm:$0xff] %v4179_v39  ;;  %v4183_v57 = vand.u32 4294901760, %v4179_v39  ;;  %v4185_v2 = vadd.f32 %v1189_v51, %v1027_v38  ;;  %v4217_v49 = vsub.f32 %v4173_v52, %v4192_v22  ;;  %v4225_v26 = vand.u32 4294901760, %v4189_v42  ;;  %vm1236_vm9 = vmxor %vm1234_vm8, %vm3592_vm3  ;;  %s3548_s27 = scalar_lea.vmem %s2619_s0, 2048  ;;  %p3553_p1 = scmp.lt.s32.totalorder %s2619_s0, %s2619_s0 }
 0x134   :  { %v1389_v28 = vand.u32 4294901760, %v1388_v25  ;;  %v1395_v62 = vsub.f32 %v4250_v23, %v4269_v34  ;;  %v4320_v38 = vsub.f32 %v4115_v29, %v4302_v48  ;;  %v4323_v51 = vand.u32 4294901760, %v4122_v44  ;;  %p3549_p0 = scmp.ne.s32.totalorder %s2619_s0, %s3548_s27  ;;  %p3554_p2 = scmp.lt.s32.totalorder %s3548_s27, %s3548_s27 }
 0x135   :  { %v4196_v37 = vsub.f32 %v4179_v39, %v4183_v57  ;;  %1229 = vst [vmem:[#allocation5 + $0x70] sm:$0xff] %v4185_v2  ;;  %v4200_v45 = vand.u32 4294901760, %v4185_v2  ;;  %3119 = vmatprep.subr.mxu0 %v4183_v57  ;;  %v1374_v20 = vsub.f32 %v4189_v42, %v4225_v26  ;;  %v4241_v12 = vand.u32 4294901760, %v4217_v49 }
 0x136   :  { %3120 = vmatpush3.xpose.msra.mxu0 %v4183_v57  ;;  %v1396_v50 = vand.u32 4294901760, %v1395_v62  ;;  %v4354_v62 = vand.u32 4294901760, %v4108_v6  ;;  %p3555_p3 = por %p3554_p2, %p3553_p1 }
 0x137   :  { %v4206_v31 = vsub.f32 %v4185_v2, %v4200_v45  ;;  %3121 = vmatprep.subr.mxu0 %v4200_v45  ;;  %v4210_v59 = vand.u32 4294901760, %v4196_v37  ;;  %v1375_v30 = vand.u32 4294901760, %v1374_v20  ;;  %v1381_v4 = vsub.f32 %v4217_v49, %v4241_v12 }
 0x138   :  { %v4337_v20 = vsub.f32 %v4122_v44, %v4323_v51  ;;  %p3556_p4 = pnand %p3555_p3, %p3549_p0 }
 0x139   :  { %v1360_v17 = vsub.f32 %v4196_v37, %v4210_v59  ;;  %v4222_v24 = vand.u32 4294901760, %v4206_v31  ;;  %v1382_v3 = vand.u32 4294901760, %v1381_v4 }
 0x13a   :  { %3122 = vmatpush3.xpose.msra.mxu0 %v4200_v45 }
 0x13b   :  { %3123 = vmatprep.subr.mxu0 %v4176_v19  ;;  %v1361_v60 = vand.u32 4294901760, %v1360_v17  ;;  %v1367_v58 = vsub.f32 %v4206_v31, %v4222_v24  ;;  %v1410_v17 = vand.u32 4294901760, %v1409_v35  ;;  %v4364_v35 = vand.u32 4294901760, %v4093_v14 }
 0x13d   :  { %3154 = vmatprep.subr.mxu1 %v1361_v60  ;;  %v1368_v27 = vand.u32 4294901760, %v1367_v58  ;;  %v4328_v58 = vand.u32 4294901760, %v4306_v7 }
 0x13e   :  { %3124 = vmatpush3.xpose.msra.mxu0 %v4176_v19  ;;  %3155 = vmatpush3.xpose.msra.mxu1 %v1361_v60  ;;  %v1416_v60 = vsub.f32 %v4289_v46, %v4311_v47 }
 0x13f   :  { %3125 = vmatprep.subr.mxu0 %v4192_v22  ;;  %3156 = vmatprep.subr.mxu1 %v1368_v27  ;;  %v1423_v4 = vsub.f32 %v4306_v7, %v4328_v58 }
 0x142   :  { %3126 = vmatpush3.xpose.msra.mxu0 %v4192_v22  ;;  %3157 = vmatpush3.xpose.msra.mxu1 %v1368_v27  ;;  %v4333_v27 = vand.u32 4294901760, %v4103_v55 }
 0x143   :  { %3127 = vmatprep.subr.mxu0 %v4213_v43  ;;  %3158 = vmatprep.subr.mxu1 %v1375_v30 }
 0x144   :  { %v4349_v25 = vsub.f32 %v4103_v55, %v4333_v27 }
 0x146   :  { %3128 = vmatpush3.xpose.msra.mxu0 %v4213_v43  ;;  %3159 = vmatpush3.xpose.msra.mxu1 %v1375_v30  ;;  %v1417_v30 = vand.u32 4294901760, %v1416_v60  ;;  %v4376_v55 = vand.u32 4294901760, %v4349_v25 }
 0x147   :  { %3129 = vmatprep.subr.mxu0 %v4236_v21  ;;  %3160 = vmatprep.subr.mxu1 %v1382_v3 }
 0x148   :  { %v1444_v29 = vsub.f32 %v4349_v25, %v4376_v55 }
 0x14a   :  { %3130 = vmatpush3.xpose.msra.mxu0 %v4236_v21  ;;  %3161 = vmatpush3.xpose.msra.mxu1 %v1382_v3  ;;  %v4342_v3 = vand.u32 4294901760, %v4320_v38  ;;  %v1445_v54 = vand.u32 4294901760, %v1444_v29 }
 0x14b   :  { %3131 = vmatprep.subr.mxu0 %v4246_v53  ;;  %3162 = vmatprep.subr.mxu1 %v1389_v28 }
 0x14c   :  { %v1430_v32 = vsub.f32 %v4320_v38, %v4342_v3 }
 0x14e   :  { %3132 = vmatpush3.xpose.msra.mxu0 %v4246_v53  ;;  %3163 = vmatpush3.xpose.msra.mxu1 %v1389_v28  ;;  %v4351_v28 = vsel %vm1236_vm9, %v1232_v13, 0.0  ;;  %v1431_v60 = vand.u32 4294901760, %v1430_v32  ;;  %v4389_v32 = vand.u32 4294901760, %v4098_v11 }
 0x14f   :  { %3133 = vmatprep.subr.mxu0 %v4264_v40  ;;  %3164 = vmatprep.subr.mxu1 %v1396_v50  ;;  %v4367_v13 = vand.u32 4294901760, %v4351_v28 }
 0x150   :  { %v4401_v1 = vsub.f32 %v4098_v11, %v4389_v32 }
 0x152   :  { %3134 = vmatpush3.xpose.msra.mxu0 %v4264_v40  ;;  %3165 = vmatpush3.xpose.msra.mxu1 %v1396_v50  ;;  %v1424_v50 = vand.u32 4294901760, %v1423_v4  ;;  %v4416_v10 = vand.u32 4294901760, %v4401_v1 }
 0x153   :  { %3135 = vmatprep.subr.mxu0 %v4274_v8  ;;  %3166 = vmatprep.subr.mxu1 %v1403_v15 }
 0x156   :  { %3136 = vmatpush3.xpose.msra.mxu0 %v4274_v8  ;;  %3167 = vmatpush3.xpose.msra.mxu1 %v1403_v15  ;;  %v4359_v15 = vand.u32 4294901760, %v4337_v20 }
 0x157   :  { %3137 = vmatprep.subr.mxu0 %v4292_v5  ;;  %3168 = vmatprep.subr.mxu1 %v1410_v17 }
 0x158   :  { %v1437_v4 = vsub.f32 %v4337_v20, %v4359_v15 }
 0x15a   :  { %3138 = vmatpush3.xpose.msra.mxu0 %v4292_v5  ;;  %3169 = vmatpush3.xpose.msra.mxu1 %v1410_v17  ;;  %v4371_v17 = vsub.f32 %v4108_v6, %v4354_v62  ;;  %v4386_v6 = vsub.f32 %v4351_v28, %v4367_v13  ;;  %v1438_v44 = vand.u32 4294901760, %v1437_v4 }
 0x15b   :  { %3139 = vmatprep.subr.mxu0 %v4302_v48  ;;  %3170 = vmatprep.subr.mxu1 %v1417_v30 }
 0x15c   :  { %v5023_v11 = vand.u32 4294901760, %v4386_v6 }
 0x15e   :  { %3140 = vmatpush3.xpose.msra.mxu0 %v4302_v48  ;;  %3171 = vmatpush3.xpose.msra.mxu1 %v1417_v30  ;;  %v4382_v30 = vsub.f32 %v4093_v14, %v4364_v35  ;;  %v1349_v29 = vsub.f32 %v4386_v6, %v5023_v11 }
 0x15f   :  { %3141 = vmatprep.subr.mxu0 %v4323_v51  ;;  %3172 = vmatprep.subr.mxu1 %v1424_v50 }
 0x160   :  { %v4406_v18 = vand.u32 4294901760, %v4382_v30  ;;  %v1350_v36 = vand.u32 4294901760, %v1349_v29 }
 0x162   :  { %3142 = vmatpush3.xpose.msra.mxu0 %v4323_v51  ;;  %3173 = vmatpush3.xpose.msra.mxu1 %v1424_v50  ;;  %v4394_v50 = vand.u32 4294901760, %v4371_v17  ;;  %v1458_v14 = vsub.f32 %v4382_v30, %v4406_v18 }
 0x163   :  { %3143 = vmatprep.subr.mxu0 %v4333_v27  ;;  %3174 = vmatprep.subr.mxu1 %v1431_v60 }
 0x164   :  { %v1451_v4 = vsub.f32 %v4371_v17, %v4394_v50 }
 0x166   :  { %3144 = vmatpush3.xpose.msra.mxu0 %v4333_v27  ;;  %3175 = vmatpush3.xpose.msra.mxu1 %v1431_v60  ;;  %v1452_v60 = vand.u32 4294901760, %v1451_v4  ;;  %v1465_v4 = vsub.f32 %v4401_v1, %v4416_v10 }
 0x167   :  { %3145 = vmatprep.subr.mxu0 %v4354_v62  ;;  %3176 = vmatprep.subr.mxu1 %v1438_v44 }
 0x168   :  { %v1466_v11 = vand.u32 4294901760, %v1465_v4 }
 0x16a   :  { %3146 = vmatpush3.xpose.msra.mxu0 %v4354_v62  ;;  %3177 = vmatpush3.xpose.msra.mxu1 %v1438_v44  ;;  %v1459_v44 = vand.u32 4294901760, %v1458_v14 }
 0x16b   :  { %3147 = vmatprep.subr.mxu0 %v4364_v35  ;;  %3178 = vmatprep.subr.mxu1 %v1445_v54 }
 0x16e   :  { %3148 = vmatpush3.xpose.msra.mxu0 %v4364_v35  ;;  %3179 = vmatpush3.xpose.msra.mxu1 %v1445_v54  ;;  %v5024_v54 = vld [vmem:[#allocation13_spill] sm:$0xff] }
 0x16f   :  { %3149 = vmatprep.subr.mxu0 %v4389_v32  ;;  %3180 = vmatprep.subr.mxu1 %v1452_v60  ;;  %v5025_v14 = vand.u32 4294901760, %v5024_v54 }
 0x172   :  { %3150 = vmatpush3.xpose.msra.mxu0 %v4389_v32  ;;  %3181 = vmatpush3.xpose.msra.mxu1 %v1452_v60 }
 0x173   :  { %3182 = vmatprep.subr.mxu1 %v1459_v44  ;;  %3189 = vmatprep.subr.mxu0 %v4196_v37 }
 0x175   :  { %3152 = vmatmul.mubr.f32.vlgmr.msra.gmra.mxu0 %v1350_v36  ;;  %v5026_v36 = vld [vmem:[#allocation10_spill] sm:$0xff] }
 0x176   :  { %3183 = vmatpush3.xpose.msra.mxu1 %v1459_v44  ;;  %3190 = vmatpush3.xpose.msra.mxu0 %v4196_v37  ;;  %v1940_v37 = vmul.f32 %v4351_v28, %v4351_v28 }
 0x177   :  { %3184 = vmatprep.subr.mxu1 %v1466_v11  ;;  %3191 = vmatprep.subr.mxu0 %v4206_v31 }
 0x178   :  { %3221 = vmatprep.mubr.f32.mxu0 %v5024_v54 }
 0x17a   :  { %3185 = vmatpush3.xpose.msra.mxu1 %v1466_v11  ;;  %3192 = vmatpush3.xpose.msra.mxu0 %v4206_v31  ;;  %v5028_v31 = vand.u32 4294901760, %v4386_v6 }
 0x17b   :  { %3193 = vmatprep.subr.mxu0 %v4189_v42  ;;  %3224 = vmatprep.subr.mxu1 %v4183_v57 }
 0x17d   :  { %3187 = vmatmul.mubr.f32.vlgmr.msra.gmra.mxu1 %v4367_v13 }
 0x17e   :  { %3194 = vmatpush3.xpose.msra.mxu0 %v4189_v42  ;;  %3225 = vmatpush3.xpose.msra.mxu1 %v4183_v57  ;;  %v1939_v42 = vmul.f32 %v5026_v36, %v5026_v36 }
 0x17f   :  { %3195 = vmatprep.subr.mxu0 %v4217_v49  ;;  %3226 = vmatprep.subr.mxu1 %v4200_v45 }
 0x180   :  { %3256 = vmatprep.mubr.f32.mxu1 %v5025_v14  ;;  %1941 = vadd.xlane.f32.xlu0 %v1939_v42  ;;  %v5035_v14 = vld [vmem:[#allocation28_spill] sm:$0xff] }
 0x181   :  { %v1949_v36 = vmul.f32 %v5035_v14, %v5035_v14 }
 0x182   :  { %3196 = vmatpush3.xpose.msra.mxu0 %v4217_v49  ;;  %3227 = vmatpush3.xpose.msra.mxu1 %v4200_v45 }
 0x183   :  { %3197 = vmatprep.subr.mxu0 %v4233_v0  ;;  %3228 = vmatprep.subr.mxu1 %v4176_v19 }
 0x184   :  { %1943 = vadd.xlane.f32.xlu0 %v1940_v37 }
 0x186   :  { %3198 = vmatpush3.xpose.msra.mxu0 %v4233_v0  ;;  %3229 = vmatpush3.xpose.msra.mxu1 %v4176_v19 }
 0x187   :  { %3199 = vmatprep.subr.mxu0 %v4250_v23  ;;  %3230 = vmatprep.subr.mxu1 %v4192_v22 }
 0x18a   :  { %3200 = vmatpush3.xpose.msra.mxu0 %v4250_v23  ;;  %3231 = vmatpush3.xpose.msra.mxu1 %v4192_v22 }
 0x18b   :  { %3201 = vmatprep.subr.mxu0 %v4261_v63  ;;  %3232 = vmatprep.subr.mxu1 %v4213_v43 }
 0x18e   :  { %3202 = vmatpush3.xpose.msra.mxu0 %v4261_v63  ;;  %3233 = vmatpush3.xpose.msra.mxu1 %v4213_v43 }
 0x18f   :  { %3203 = vmatprep.subr.mxu0 %v4278_v9  ;;  %3234 = vmatprep.subr.mxu1 %v4236_v21 }
 0x192   :  { %3204 = vmatpush3.xpose.msra.mxu0 %v4278_v9  ;;  %3235 = vmatpush3.xpose.msra.mxu1 %v4236_v21 }
 0x193   :  { %3205 = vmatprep.subr.mxu0 %v4289_v46  ;;  %3236 = vmatprep.subr.mxu1 %v4246_v53 }
 0x196   :  { %3206 = vmatpush3.xpose.msra.mxu0 %v4289_v46  ;;  %3237 = vmatpush3.xpose.msra.mxu1 %v4246_v53  ;;  %v5031_v46 = vld [vmem:[#allocation16_spill] sm:$0xff] }
 0x197   :  { %3207 = vmatprep.subr.mxu0 %v4306_v7  ;;  %3238 = vmatprep.subr.mxu1 %v4264_v40 }
 0x19a   :  { %3208 = vmatpush3.xpose.msra.mxu0 %v4306_v7  ;;  %3239 = vmatpush3.xpose.msra.mxu1 %v4264_v40 }
 0x19b   :  { %3209 = vmatprep.subr.mxu0 %v4320_v38  ;;  %3240 = vmatprep.subr.mxu1 %v4274_v8 }
 0x19e   :  { %3210 = vmatpush3.xpose.msra.mxu0 %v4320_v38  ;;  %3241 = vmatpush3.xpose.msra.mxu1 %v4274_v8 }
 0x19f   :  { %3211 = vmatprep.subr.mxu0 %v4337_v20  ;;  %3242 = vmatprep.subr.mxu1 %v4292_v5 }
 0x1a2   :  { %3212 = vmatpush3.xpose.msra.mxu0 %v4337_v20  ;;  %3243 = vmatpush3.xpose.msra.mxu1 %v4292_v5 }
 0x1a3   :  { %3213 = vmatprep.subr.mxu0 %v4349_v25  ;;  %3244 = vmatprep.subr.mxu1 %v4302_v48 }
 0x1a6   :  { %3214 = vmatpush3.xpose.msra.mxu0 %v4349_v25  ;;  %3245 = vmatpush3.xpose.msra.mxu1 %v4302_v48 }
 0x1a7   :  { %3215 = vmatprep.subr.mxu0 %v4371_v17  ;;  %3246 = vmatprep.subr.mxu1 %v4323_v51 }
 0x1aa   :  { %3216 = vmatpush3.xpose.msra.mxu0 %v4371_v17  ;;  %3247 = vmatpush3.xpose.msra.mxu1 %v4323_v51 }
 0x1ab   :  { %3217 = vmatprep.subr.mxu0 %v4382_v30  ;;  %3248 = vmatprep.subr.mxu1 %v4333_v27 }
 0x1ae   :  { %3218 = vmatpush3.xpose.msra.mxu0 %v4382_v30  ;;  %3249 = vmatpush3.xpose.msra.mxu1 %v4333_v27 }
 0x1af   :  { %3219 = vmatprep.subr.mxu0 %v4401_v1  ;;  %3250 = vmatprep.subr.mxu1 %v4354_v62 }
 0x1b2   :  { %3220 = vmatpush3.xpose.msra.mxu0 %v4401_v1  ;;  %3251 = vmatpush3.xpose.msra.mxu1 %v4354_v62  ;;  %v5027_v1 = vld [vmem:[#allocation11_spill] sm:$0xff] }
 0x1b3   :  { %3252 = vmatprep.subr.mxu1 %v4364_v35  ;;  %3259 = vmatprep.subr.mxu0 %v4210_v59 }
 0x1b5   :  { %3222 = vmatmul.mubr.f32.vlgmr.msra.gmra.mxu0 %v4386_v6  ;;  %v1960_v6 = vmul.f32 %v4179_v39, %v4179_v39  ;;  %v1958_v39 = vmul.f32 %v4169_v56, %v4169_v56 }
 0x1b6   :  { %3253 = vmatpush3.xpose.msra.mxu1 %v4364_v35  ;;  %3260 = vmatpush3.xpose.msra.mxu0 %v4210_v59 }
 0x1b7   :  { %3254 = vmatprep.subr.mxu1 %v4389_v32  ;;  %3261 = vmatprep.subr.mxu0 %v4222_v24 }
 0x1b8   :  { %3291 = vmatprep.mubr.f32.mxu0 %v5027_v1 }
 0x1ba   :  { %3255 = vmatpush3.xpose.msra.mxu1 %v4389_v32  ;;  %3262 = vmatpush3.xpose.msra.mxu0 %v4222_v24 }
 0x1bb   :  { %3263 = vmatprep.subr.mxu0 %v4225_v26  ;;  %3294 = vmatprep.subr.mxu1 %v4183_v57 }
 0x1bd   :  { %3257 = vmatmul.mubr.f32.vlgmr.msra.gmra.mxu1 %v5028_v31 }
 0x1be   :  { %3264 = vmatpush3.xpose.msra.mxu0 %v4225_v26  ;;  %3295 = vmatpush3.xpose.msra.mxu1 %v4183_v57 }
 0x1bf   :  { %3265 = vmatprep.subr.mxu0 %v4241_v12  ;;  %3296 = vmatprep.subr.mxu1 %v4200_v45 }
 0x1c0   :  { %3326 = vmatprep.mubr.f32.mxu1 %v5027_v1 }
 0x1c2   :  { %3266 = vmatpush3.xpose.msra.mxu0 %v4241_v12  ;;  %3297 = vmatpush3.xpose.msra.mxu1 %v4200_v45  ;;  %v4577_v45 = vand.u32 4294901760, %v1958_v39 }
 0x1c3   :  { %3267 = vmatprep.subr.mxu0 %v4255_v61  ;;  %3298 = vmatprep.subr.mxu1 %v4176_v19 }
 0x1c4   :  { %v4597_v24 = vsub.f32 %v1958_v39, %v4577_v45 }
 0x1c6   :  { %3268 = vmatpush3.xpose.msra.mxu0 %v4255_v61  ;;  %3299 = vmatpush3.xpose.msra.mxu1 %v4176_v19  ;;  %v4558_v19 = vand.u32 4294901760, %v1960_v6  ;;  %v5030_v61 = vld [vmem:[#allocation31_spill] sm:$0xff] }
 0x1c7   :  { %3269 = vmatprep.subr.mxu0 %v4269_v34  ;;  %3300 = vmatprep.subr.mxu1 %v4192_v22  ;;  %v1954_v63 = vmul.f32 %v5030_v61, %v5030_v61 }
 0x1ca   :  { %3270 = vmatpush3.xpose.msra.mxu0 %v4269_v34  ;;  %3301 = vmatpush3.xpose.msra.mxu1 %v4192_v22  ;;  %v4569_v22 = vsub.f32 %v1960_v6, %v4558_v19 }
 0x1cb   :  { %3271 = vmatprep.subr.mxu0 %v4283_v16  ;;  %3302 = vmatprep.subr.mxu1 %v4213_v43 }
 0x1cc   :  { %v2050_v56 = vand.u32 4294901760, %v4569_v22 }
 0x1ce   :  { %3272 = vmatpush3.xpose.msra.mxu0 %v4283_v16  ;;  %3303 = vmatpush3.xpose.msra.mxu1 %v4213_v43 }
 0x1cf   :  { %3273 = vmatprep.subr.mxu0 %v4297_v41  ;;  %3304 = vmatprep.subr.mxu1 %v4236_v21 }
 0x1d2   :  { %3274 = vmatpush3.xpose.msra.mxu0 %v4297_v41  ;;  %3305 = vmatpush3.xpose.msra.mxu1 %v4236_v21  ;;  %v4638_v41 = vand.u32 4294901760, %v1954_v63 }
 0x1d3   :  { %3275 = vmatprep.subr.mxu0 %v4311_v47  ;;  %3306 = vmatprep.subr.mxu1 %v4246_v53 }
 0x1d4   :  { %v4659_v28 = vsub.f32 %v1954_v63, %v4638_v41 }
 0x1d6   :  { %3276 = vmatpush3.xpose.msra.mxu0 %v4311_v47  ;;  %3307 = vmatpush3.xpose.msra.mxu1 %v4246_v53  ;;  %v2064_v53 = vand.u32 4294901760, %v4597_v24  ;;  %v2092_v30 = vand.u32 4294901760, %v4659_v28 }
 0x1d7   :  { %3277 = vmatprep.subr.mxu0 %v4328_v58  ;;  %3308 = vmatprep.subr.mxu1 %v4264_v40 }
 0x1d8   :  { %v2093_v4 = vsub.f32 %v4659_v28, %v2092_v30 }
 0x1da   :  { %3278 = vmatpush3.xpose.msra.mxu0 %v4328_v58  ;;  %3309 = vmatpush3.xpose.msra.mxu1 %v4264_v40  ;;  %v2094_v37 = vand.u32 4294901760, %v2093_v4 }
 0x1db   :  { %3279 = vmatprep.subr.mxu0 %v4342_v3  ;;  %3310 = vmatprep.subr.mxu1 %v4274_v8 }
 0x1de   :  { %3280 = vmatpush3.xpose.msra.mxu0 %v4342_v3  ;;  %3311 = vmatpush3.xpose.msra.mxu1 %v4274_v8  ;;  %v2065_v8 = vsub.f32 %v4597_v24, %v2064_v53 }
 0x1df   :  { %3281 = vmatprep.subr.mxu0 %v4359_v15  ;;  %3312 = vmatprep.subr.mxu1 %v4292_v5 }
 0x1e2   :  { %3282 = vmatpush3.xpose.msra.mxu0 %v4359_v15  ;;  %3313 = vmatpush3.xpose.msra.mxu1 %v4292_v5  ;;  %v1953_v5 = vmul.f32 %v5031_v46, %v5031_v46 }
 0x1e3   :  { %3283 = vmatprep.subr.mxu0 %v4376_v55  ;;  %3314 = vmatprep.subr.mxu1 %v4302_v48 }
 0x1e6   :  { %3284 = vmatpush3.xpose.msra.mxu0 %v4376_v55  ;;  %3315 = vmatpush3.xpose.msra.mxu1 %v4302_v48  ;;  %v1959_v55 = vmul.f32 %v4185_v2, %v4185_v2  ;;  %v1957_v2 = vmul.f32 %v4173_v52, %v4173_v52  ;;  %v2051_v52 = vsub.f32 %v4569_v22, %v2050_v56  ;;  %v2066_v48 = vand.u32 4294901760, %v2065_v8 }
 0x1e7   :  { %3285 = vmatprep.subr.mxu0 %v4394_v50  ;;  %3316 = vmatprep.subr.mxu1 %v4323_v51 }
 0x1e8   :  { %v4566_v57 = vand.u32 4294901760, %v1959_v55  ;;  %v4593_v43 = vand.u32 4294901760, %v1957_v2  ;;  %v2052_v21 = vand.u32 4294901760, %v2051_v52 }
 0x1ea   :  { %3286 = vmatpush3.xpose.msra.mxu0 %v4394_v50  ;;  %3317 = vmatpush3.xpose.msra.mxu1 %v4323_v51  ;;  %v4581_v59 = vsub.f32 %v1959_v55, %v4566_v57  ;;  %v4614_v23 = vsub.f32 %v1957_v2, %v4593_v43  ;;  %v5032_v51 = vld [vmem:[#allocation29_spill] sm:$0xff]  ;;  %v5034_v50 = vld [vmem:[#allocation27_spill] sm:$0xff]  ;;  %v4708_v2 = vand.u32 4294901760, %v1949_v36 }
 0x1eb   :  { %3287 = vmatprep.subr.mxu0 %v4406_v18  ;;  %3318 = vmatprep.subr.mxu1 %v4333_v27  ;;  %v1952_v58 = vmul.f32 %v5032_v51, %v5032_v51  ;;  %v1950_v60 = vmul.f32 %v5034_v50, %v5034_v50  ;;  %v5036_v55 = vld [vmem:[#allocation25_spill] sm:$0xff] }
 0x1ec   :  { %v2057_v49 = vand.u32 4294901760, %v4581_v59  ;;  %v2071_v9 = vand.u32 4294901760, %v4614_v23  ;;  %v1948_v39 = vmul.f32 %v5036_v55, %v5036_v55  ;;  %v4729_v46 = vsub.f32 %v1949_v36, %v4708_v2 }
 0x1ed   :  { %v4694_v42 = vand.u32 4294901760, %v1950_v60 }
 0x1ee   :  { %3288 = vmatpush3.xpose.msra.mxu0 %v4406_v18  ;;  %3319 = vmatpush3.xpose.msra.mxu1 %v4333_v27  ;;  %v3593_v18 = vmov 0.0   ;;  %v2058_v12 = vsub.f32 %v4581_v59, %v2057_v49  ;;  %v2072_v7 = vsub.f32 %v4614_v23, %v2071_v9  ;;  %v4652_v27 = vand.u32 4294901760, %v1953_v5 }
 0x1ef   :  { %3289 = vmatprep.subr.mxu0 %v4416_v10  ;;  %3320 = vmatprep.subr.mxu1 %v4354_v62  ;;  %v4722_v61 = vand.u32 4294901760, %v1948_v39 }
 0x1f0   :  { %v2059_v34 = vand.u32 4294901760, %v2058_v12  ;;  %v2073_v20 = vand.u32 4294901760, %v2072_v7 }
 0x1f2   :  { %3290 = vmatpush3.xpose.msra.mxu0 %v4416_v10  ;;  %3321 = vmatpush3.xpose.msra.mxu1 %v4354_v62  ;;  %v1956_v10 = vmul.f32 %v4157_v33, %v4157_v33  ;;  %v5029_v33 = vld [vmem:[#allocation18_spill] sm:$0xff] }
 0x1f3   :  { %3322 = vmatprep.subr.mxu1 %v4364_v35  ;;  %3329 = vmatprep.subr.mxu0 %v3593_v18  ;;  %v1955_v26 = vmul.f32 %v5029_v33, %v5029_v33  ;;  %v5033_v62 = vld [vmem:[#allocation30_spill] sm:$0xff] }
 0x1f4   :  { %v4607_v0 = vand.u32 4294901760, %v1956_v10  ;;  %v1951_v15 = vmul.f32 %v5033_v62, %v5033_v62  ;;  %v3547_v62 = vld [vmem:[#allocation5] sm:$0xff] }
 0x1f5   :  { %3292 = vmatmul.mubr.f32.vlgmr.msra.gmra.mxu0 %v4367_v13  ;;  %v4622_v40 = vand.u32 4294901760, %v1955_v26 }
 0x1f6   :  { %3323 = vmatpush3.xpose.msra.mxu1 %v4364_v35  ;;  %3330 = vmatpush3.xpose.msra.mxu0 %v4558_v19  ;;  %v4629_v16 = vsub.f32 %v1956_v10, %v4607_v0  ;;  %v4666_v35 = vand.u32 4294901760, %v1952_v58  ;;  %v4680_v29 = vand.u32 4294901760, %v1951_v15 }
 0x1f7   :  { %3324 = vmatprep.subr.mxu1 %v4389_v32  ;;  %3331 = vmatprep.subr.mxu0 %v3593_v18  ;;  %v4645_v38 = vsub.f32 %v1955_v26, %v4622_v40  ;;  %v4715_v26 = vsub.f32 %v1950_v60, %v4694_v42 }
 0x1f8   :  { %3361 = vmatprep.mubr.msk.f32.mxu0 %vm3594_vm10, %v3593_v18  ;;  %v2078_v47 = vand.u32 4294901760, %v4629_v16  ;;  %v4687_v54 = vsub.f32 %v1952_v58, %v4666_v35  ;;  %v4701_v6 = vsub.f32 %v1951_v15, %v4680_v29  ;;  %v1945_v15 = vmul.f32 %v3547_v62, %v3547_v62 }
 0x1f9   :  { %v2085_v25 = vand.u32 4294901760, %v4645_v38  ;;  %v2120_v8 = vand.u32 4294901760, %v4715_v26  ;;  %v3595_v62 = vmov 1.0  }
 0x1fa   :  { %3325 = vmatpush3.xpose.msra.mxu1 %v4389_v32  ;;  %3332 = vmatpush3.xpose.msra.mxu0 %v4566_v57  ;;  %v2079_v3 = vsub.f32 %v4629_v16, %v2078_v47  ;;  %v4673_v32 = vsub.f32 %v1953_v5, %v4652_v27  ;;  %v2106_v31 = vand.u32 4294901760, %v4687_v54  ;;  %v2113_v33 = vand.u32 4294901760, %v4701_v6  ;;  %v5038_v5 = vld [vmem:[#allocation24_spill] sm:$0xff] }
 0x1fb   :  { %3333 = vmatprep.subr.mxu0 %v3593_v18  ;;  %3364 = vmatprep.subr.mxu1 %v3593_v18  ;;  %v2086_v17 = vsub.f32 %v4645_v38, %v2085_v25  ;;  %v2121_v58 = vsub.f32 %v4715_v26, %v2120_v8  ;;  %v4760_v4 = vand.u32 4294901760, %v1945_v15 }
 0x1fc   :  { %v2099_v11 = vand.u32 4294901760, %v4673_v32  ;;  %v2107_v52 = vsub.f32 %v4687_v54, %v2106_v31 }
 0x1fd   :  { %3327 = vmatmul.mubr.f32.vlgmr.msra.gmra.mxu1 %v4367_v13  ;;  %v2080_v13 = vand.u32 4294901760, %v2079_v3  ;;  %v2087_v44 = vand.u32 4294901760, %v2086_v17  ;;  %v4743_v3 = vsub.f32 %v1948_v39, %v4722_v61  ;;  %v2122_v17 = vand.u32 4294901760, %v2121_v58 }
 0x1fe   :  { %3334 = vmatpush3.xpose.msra.mxu0 %v4577_v45  ;;  %3365 = vmatpush3.xpose.msra.mxu1 %v2052_v21  ;;  %v2100_v1 = vsub.f32 %v4673_v32, %v2099_v11  ;;  %v5037_v21 = vld [vmem:[#allocation26_spill] sm:$0xff]  ;;  %v2108_v63 = vand.u32 4294901760, %v2107_v52  ;;  %v4777_v52 = vsub.f32 %v1945_v15, %v4760_v4 }
 0x1ff   :  { %3335 = vmatprep.subr.mxu0 %v3593_v18  ;;  %3366 = vmatprep.subr.mxu1 %v3593_v18  ;;  %v1947_v12 = vmul.f32 %v5037_v21, %v5037_v21  ;;  %v2134_v60 = vand.u32 4294901760, %v4743_v3 }
 0x200   :  { %3396 = vmatprep.mubr.msk.f32.mxu1 %vm3594_vm10, %v3593_v18  ;;  %v2101_v10 = vand.u32 4294901760, %v2100_v1 }
 0x201   :  { %v4736_v7 = vand.u32 4294901760, %v1947_v12  ;;  %v2135_v36 = vsub.f32 %v4743_v3, %v2134_v60 }
 0x202   :  { %3336 = vmatpush3.xpose.msra.mxu0 %v4593_v43  ;;  %3367 = vmatpush3.xpose.msra.mxu1 %v2059_v34  ;;  %v2114_v34 = vsub.f32 %v4701_v6, %v2113_v33 }
 0x203   :  { %3337 = vmatprep.subr.mxu0 %v3593_v18  ;;  %3368 = vmatprep.subr.mxu1 %v3593_v18  ;;  %v2136_v55 = vand.u32 4294901760, %v2135_v36 }
 0x204   :  { %v2115_v51 = vand.u32 4294901760, %v2114_v34 }
 0x206   :  { %3338 = vmatpush3.xpose.msra.mxu0 %v4607_v0  ;;  %3369 = vmatpush3.xpose.msra.mxu1 %v2066_v48  ;;  %v1946_v48 = vmul.f32 %v5038_v5, %v5038_v5 }
 0x207   :  { %3339 = vmatprep.subr.mxu0 %v3593_v18  ;;  %3370 = vmatprep.subr.mxu1 %v3593_v18 }
 0x20a   :  { %3340 = vmatpush3.xpose.msra.mxu0 %v4622_v40  ;;  %3371 = vmatpush3.xpose.msra.mxu1 %v2073_v20  ;;  %v2127_v20 = vand.u32 4294901760, %v4729_v46 }
 0x20b   :  { %3341 = vmatprep.subr.mxu0 %v3593_v18  ;;  %3372 = vmatprep.subr.mxu1 %v3593_v18 }
 0x20c   :  { %v2128_v50 = vsub.f32 %v4729_v46, %v2127_v20 }
 0x20e   :  { %3342 = vmatpush3.xpose.msra.mxu0 %v4638_v41  ;;  %3373 = vmatpush3.xpose.msra.mxu1 %v2080_v13  ;;  %v4748_v13 = vand.u32 4294901760, %v1946_v48  ;;  %v2129_v14 = vand.u32 4294901760, %v2128_v50 }
 0x20f   :  { %3343 = vmatprep.subr.mxu0 %v3593_v18  ;;  %3374 = vmatprep.subr.mxu1 %v3593_v18 }
 0x210   :  { %v4767_v1 = vsub.f32 %v1946_v48, %v4748_v13 }
 0x212   :  { %3344 = vmatpush3.xpose.msra.mxu0 %v4652_v27  ;;  %3375 = vmatpush3.xpose.msra.mxu1 %v2087_v44  ;;  %v4755_v44 = vsub.f32 %v1947_v12, %v4736_v7 }
 0x213   :  { %3345 = vmatprep.subr.mxu0 %v3593_v18  ;;  %3376 = vmatprep.subr.mxu1 %v3593_v18 }
 0x216   :  { %3346 = vmatpush3.xpose.msra.mxu0 %v4666_v35  ;;  %3377 = vmatpush3.xpose.msra.mxu1 %v2094_v37  ;;  %v2141_v37 = vand.u32 4294901760, %v4755_v44 }
 0x217   :  { %3347 = vmatprep.subr.mxu0 %v3593_v18  ;;  %3378 = vmatprep.subr.mxu1 %v3593_v18 }
 0x218   :  { %v2142_v39 = vsub.f32 %v4755_v44, %v2141_v37 }
 0x21a   :  { %3348 = vmatpush3.xpose.msra.mxu0 %v4680_v29  ;;  %3379 = vmatpush3.xpose.msra.mxu1 %v2101_v10  ;;  %v2148_v10 = vand.u32 4294901760, %v4767_v1  ;;  %v2143_v21 = vand.u32 4294901760, %v2142_v39 }
 0x21b   :  { %3349 = vmatprep.subr.mxu0 %v3593_v18  ;;  %3380 = vmatprep.subr.mxu1 %v3593_v18 }
 0x21c   :  { %v2149_v12 = vsub.f32 %v4767_v1, %v2148_v10 }
 0x21e   :  { %3350 = vmatpush3.xpose.msra.mxu0 %v4694_v42  ;;  %3381 = vmatpush3.xpose.msra.mxu1 %v2108_v63  ;;  %v2155_v63 = vand.u32 4294901760, %v4777_v52  ;;  %v2150_v34 = vand.u32 4294901760, %v2149_v12 }
 0x21f   :  { %3351 = vmatprep.subr.mxu0 %v3593_v18  ;;  %3382 = vmatprep.subr.mxu1 %v3593_v18 }
 0x220   :  { %v2156_v5 = vsub.f32 %v4777_v52, %v2155_v63 }
 0x222   :  { %3352 = vmatpush3.xpose.msra.mxu0 %v4708_v2  ;;  %3383 = vmatpush3.xpose.msra.mxu1 %v2115_v51  ;;  %v2157_v48 = vand.u32 4294901760, %v2156_v5 }
 0x223   :  { %3353 = vmatprep.subr.mxu0 %v3593_v18  ;;  %3384 = vmatprep.subr.mxu1 %v3593_v18 }
 0x226   :  { %3354 = vmatpush3.xpose.msra.mxu0 %v4722_v61  ;;  %3385 = vmatpush3.xpose.msra.mxu1 %v2122_v17 }
 0x227   :  { %3355 = vmatprep.subr.mxu0 %v3593_v18  ;;  %3386 = vmatprep.subr.mxu1 %v3593_v18 }
 0x22a   :  { %3356 = vmatpush3.xpose.msra.mxu0 %v4736_v7  ;;  %3387 = vmatpush3.xpose.msra.mxu1 %v2129_v14 }
 0x22b   :  { %3357 = vmatprep.subr.mxu0 %v3593_v18  ;;  %3388 = vmatprep.subr.mxu1 %v3593_v18 }
 0x22e   :  { %3358 = vmatpush3.xpose.msra.mxu0 %v4748_v13  ;;  %3389 = vmatpush3.xpose.msra.mxu1 %v2136_v55 }
 0x22f   :  { %3359 = vmatprep.subr.mxu0 %v3593_v18  ;;  %3390 = vmatprep.subr.mxu1 %v3593_v18 }
 0x232   :  { %3360 = vmatpush3.xpose.msra.mxu0 %v4760_v4  ;;  %3391 = vmatpush3.xpose.msra.mxu1 %v2143_v21 }
 0x233   :  { %3392 = vmatprep.subr.mxu1 %v3593_v18  ;;  %3399 = vmatprep.subr.mxu0 %v3593_v18 }
 0x235   :  { %3362 = vmatmul.mubr.f32.vlgmr.msra.gmra.mxu0 %v3593_v18  ;;  %v3153_v51 = vpop.f32.mrf.mxu0 }
 0x236   :  { %3393 = vmatpush3.xpose.msra.mxu1 %v2150_v34  ;;  %3400 = vmatpush3.xpose.msra.mxu0 %v4569_v22 }
 0x237   :  { %3394 = vmatprep.subr.mxu1 %v3593_v18  ;;  %3401 = vmatprep.subr.mxu0 %v3593_v18  ;;  %v1342_v17 = vpop.f32.mrf.mxu0 }
 0x238   :  { %3431 = vmatprep.mubr.msk.f32.mxu0 %vm3594_vm10, %v3593_v18 }
 0x23a   :  { %3395 = vmatpush3.xpose.msra.mxu1 %v2157_v48  ;;  %3402 = vmatpush3.xpose.msra.mxu0 %v4581_v59 }
 0x23b   :  { %3403 = vmatprep.subr.mxu0 %v3593_v18  ;;  %3434 = vmatprep.subr.mxu1 %v3593_v18 }
 0x23d   :  { %v3188_v58 = vpop.f32.mrf.mxu1  ;;  %3397 = vmatmul.mubr.f32.vlgmr.msra.gmra.mxu1 %v3595_v62 }
 0x23e   :  { %v4802_v15 = vadd.f32 %v3188_v58, %v3153_v51  ;;  %3404 = vmatpush3.xpose.msra.mxu0 %v4597_v24  ;;  %3435 = vmatpush3.xpose.msra.mxu1 %v4558_v19 }
 0x23f   :  { %v1503_v50 = vpop.f32.mrf.mxu1  ;;  %3405 = vmatprep.subr.mxu0 %v3593_v18  ;;  %3436 = vmatprep.subr.mxu1 %v3593_v18 }
 0x240   :  { %v1504_v14 = vadd.f32 %v1503_v50, %v1342_v17  ;;  %3466 = vmatprep.mubr.msk.f32.mxu1 %vm3594_vm10, %v3593_v18 }
 0x242   :  { %3406 = vmatpush3.xpose.msra.mxu0 %v4614_v23  ;;  %3437 = vmatpush3.xpose.msra.mxu1 %v4566_v57 }
 0x243   :  { %3407 = vmatprep.subr.mxu0 %v3593_v18  ;;  %3438 = vmatprep.subr.mxu1 %v3593_v18 }
 0x246   :  { %3408 = vmatpush3.xpose.msra.mxu0 %v4629_v16  ;;  %3439 = vmatpush3.xpose.msra.mxu1 %v4577_v45 }
 0x247   :  { %3409 = vmatprep.subr.mxu0 %v3593_v18  ;;  %3440 = vmatprep.subr.mxu1 %v3593_v18 }
 0x24a   :  { %3410 = vmatpush3.xpose.msra.mxu0 %v4645_v38  ;;  %3441 = vmatpush3.xpose.msra.mxu1 %v4593_v43 }
 0x24b   :  { %3411 = vmatprep.subr.mxu0 %v3593_v18  ;;  %3442 = vmatprep.subr.mxu1 %v3593_v18 }
 0x24e   :  { %3412 = vmatpush3.xpose.msra.mxu0 %v4659_v28  ;;  %3443 = vmatpush3.xpose.msra.mxu1 %v4607_v0 }
 0x24f   :  { %3413 = vmatprep.subr.mxu0 %v3593_v18  ;;  %3444 = vmatprep.subr.mxu1 %v3593_v18 }
 0x252   :  { %3414 = vmatpush3.xpose.msra.mxu0 %v4673_v32  ;;  %3445 = vmatpush3.xpose.msra.mxu1 %v4622_v40 }
 0x253   :  { %3415 = vmatprep.subr.mxu0 %v3593_v18  ;;  %3446 = vmatprep.subr.mxu1 %v3593_v18 }
 0x256   :  { %3416 = vmatpush3.xpose.msra.mxu0 %v4687_v54  ;;  %3447 = vmatpush3.xpose.msra.mxu1 %v4638_v41 }
 0x257   :  { %3417 = vmatprep.subr.mxu0 %v3593_v18  ;;  %3448 = vmatprep.subr.mxu1 %v3593_v18 }
 0x25a   :  { %3418 = vmatpush3.xpose.msra.mxu0 %v4701_v6  ;;  %3449 = vmatpush3.xpose.msra.mxu1 %v4652_v27 }
 0x25b   :  { %3419 = vmatprep.subr.mxu0 %v3593_v18  ;;  %3450 = vmatprep.subr.mxu1 %v3593_v18 }
 0x25e   :  { %3420 = vmatpush3.xpose.msra.mxu0 %v4715_v26  ;;  %3451 = vmatpush3.xpose.msra.mxu1 %v4666_v35 }
 0x25f   :  { %3421 = vmatprep.subr.mxu0 %v3593_v18  ;;  %3452 = vmatprep.subr.mxu1 %v3593_v18 }
 0x262   :  { %3422 = vmatpush3.xpose.msra.mxu0 %v4729_v46  ;;  %3453 = vmatpush3.xpose.msra.mxu1 %v4680_v29 }
 0x263   :  { %3423 = vmatprep.subr.mxu0 %v3593_v18  ;;  %3454 = vmatprep.subr.mxu1 %v3593_v18 }
 0x266   :  { %3424 = vmatpush3.xpose.msra.mxu0 %v4743_v3  ;;  %3455 = vmatpush3.xpose.msra.mxu1 %v4694_v42 }
 0x267   :  { %3425 = vmatprep.subr.mxu0 %v3593_v18  ;;  %3456 = vmatprep.subr.mxu1 %v3593_v18 }
 0x26a   :  { %3426 = vmatpush3.xpose.msra.mxu0 %v4755_v44  ;;  %3457 = vmatpush3.xpose.msra.mxu1 %v4708_v2 }
 0x26b   :  { %3427 = vmatprep.subr.mxu0 %v3593_v18  ;;  %3458 = vmatprep.subr.mxu1 %v3593_v18 }
 0x26e   :  { %3428 = vmatpush3.xpose.msra.mxu0 %v4767_v1  ;;  %3459 = vmatpush3.xpose.msra.mxu1 %v4722_v61 }
 0x26f   :  { %3429 = vmatprep.subr.mxu0 %v3593_v18  ;;  %3460 = vmatprep.subr.mxu1 %v3593_v18 }
 0x272   :  { %3430 = vmatpush3.xpose.msra.mxu0 %v4777_v52  ;;  %3461 = vmatpush3.xpose.msra.mxu1 %v4736_v7 }
 0x273   :  { %3462 = vmatprep.subr.mxu1 %v3593_v18  ;;  %3469 = vmatprep.subr.mxu0 %v3593_v18 }
 0x275   :  { %v3223_v36 = vpop.f32.mrf.mxu0  ;;  %3432 = vmatmul.mubr.f32.vlgmr.msra.gmra.mxu0 %v3593_v18 }
 0x276   :  { %v1621_v55 = vadd.f32 %v3223_v36, %v4802_v15  ;;  %3463 = vmatpush3.xpose.msra.mxu1 %v4748_v13  ;;  %3470 = vmatpush3.xpose.msra.mxu0 %v2050_v56 }
 0x277   :  { %v1613_v39 = vpop.f32.mrf.mxu0  ;;  %3464 = vmatprep.subr.mxu1 %v3593_v18  ;;  %3471 = vmatprep.subr.mxu0 %v3593_v18 }
 0x278   :  { %v1614_v21 = vadd.f32 %v1613_v39, %v1504_v14  ;;  %3501 = vmatprep.mubr.msk.f32.mxu0 %vm3594_vm10, %v3593_v18 }
 0x27a   :  { %3465 = vmatpush3.xpose.msra.mxu1 %v4760_v4  ;;  %3472 = vmatpush3.xpose.msra.mxu0 %v2057_v49 }
 0x27b   :  { %3473 = vmatprep.subr.mxu0 %v3593_v18  ;;  %3504 = vmatprep.subr.mxu1 %v3593_v18 }
 0x27d   :  { %v3258_v22 = vpop.f32.mrf.mxu1  ;;  %3467 = vmatmul.mubr.f32.vlgmr.msra.gmra.mxu1 %v3593_v18 }
 0x27e   :  { %v1718_v56 = vadd.f32 %v3258_v22, %v1621_v55  ;;  %3474 = vmatpush3.xpose.msra.mxu0 %v2064_v53  ;;  %3505 = vmatpush3.xpose.msra.mxu1 %v4558_v19 }
 0x27f   :  { %v1709_v12 = vpop.f32.mrf.mxu1  ;;  %3475 = vmatprep.subr.mxu0 %v3593_v18  ;;  %3506 = vmatprep.subr.mxu1 %v3593_v18 }
 0x280   :  { %v1710_v59 = vadd.f32 %v1709_v12, %v1614_v21  ;;  %3536 = vmatprep.mubr.msk.f32.mxu1 %vm3594_vm10, %v3593_v18 }
 0x282   :  { %3476 = vmatpush3.xpose.msra.mxu0 %v2071_v9  ;;  %3507 = vmatpush3.xpose.msra.mxu1 %v4566_v57 }
 0x283   :  { %3477 = vmatprep.subr.mxu0 %v3593_v18  ;;  %3508 = vmatprep.subr.mxu1 %v3593_v18 }
 0x286   :  { %3478 = vmatpush3.xpose.msra.mxu0 %v2078_v47  ;;  %3509 = vmatpush3.xpose.msra.mxu1 %v4577_v45 }
 0x287   :  { %3479 = vmatprep.subr.mxu0 %v3593_v18  ;;  %3510 = vmatprep.subr.mxu1 %v3593_v18 }
 0x28a   :  { %3480 = vmatpush3.xpose.msra.mxu0 %v2085_v25  ;;  %3511 = vmatpush3.xpose.msra.mxu1 %v4593_v43 }
 0x28b   :  { %3481 = vmatprep.subr.mxu0 %v3593_v18  ;;  %3512 = vmatprep.subr.mxu1 %v3593_v18 }
 0x28e   :  { %3482 = vmatpush3.xpose.msra.mxu0 %v2092_v30  ;;  %3513 = vmatpush3.xpose.msra.mxu1 %v4607_v0 }
 0x28f   :  { %3483 = vmatprep.subr.mxu0 %v3593_v18  ;;  %3514 = vmatprep.subr.mxu1 %v3593_v18 }
 0x292   :  { %3484 = vmatpush3.xpose.msra.mxu0 %v2099_v11  ;;  %3515 = vmatpush3.xpose.msra.mxu1 %v4622_v40 }
 0x293   :  { %3485 = vmatprep.subr.mxu0 %v3593_v18  ;;  %3516 = vmatprep.subr.mxu1 %v3593_v18 }
 0x296   :  { %3486 = vmatpush3.xpose.msra.mxu0 %v2106_v31  ;;  %3517 = vmatpush3.xpose.msra.mxu1 %v4638_v41 }
 0x297   :  { %3487 = vmatprep.subr.mxu0 %v3593_v18  ;;  %3518 = vmatprep.subr.mxu1 %v3593_v18 }
 0x29a   :  { %3488 = vmatpush3.xpose.msra.mxu0 %v2113_v33  ;;  %3519 = vmatpush3.xpose.msra.mxu1 %v4652_v27 }
 0x29b   :  { %3489 = vmatprep.subr.mxu0 %v3593_v18  ;;  %3520 = vmatprep.subr.mxu1 %v3593_v18 }
 0x29e   :  { %3490 = vmatpush3.xpose.msra.mxu0 %v2120_v8  ;;  %3521 = vmatpush3.xpose.msra.mxu1 %v4666_v35 }
 0x29f   :  { %3491 = vmatprep.subr.mxu0 %v3593_v18  ;;  %3522 = vmatprep.subr.mxu1 %v3593_v18 }
 0x2a2   :  { %3492 = vmatpush3.xpose.msra.mxu0 %v2127_v20  ;;  %3523 = vmatpush3.xpose.msra.mxu1 %v4680_v29 }
 0x2a3   :  { %3493 = vmatprep.subr.mxu0 %v3593_v18  ;;  %3524 = vmatprep.subr.mxu1 %v3593_v18 }
 0x2a6   :  { %3494 = vmatpush3.xpose.msra.mxu0 %v2134_v60  ;;  %3525 = vmatpush3.xpose.msra.mxu1 %v4694_v42 }
 0x2a7   :  { %3495 = vmatprep.subr.mxu0 %v3593_v18  ;;  %3526 = vmatprep.subr.mxu1 %v3593_v18 }
 0x2aa   :  { %3496 = vmatpush3.xpose.msra.mxu0 %v2141_v37  ;;  %3527 = vmatpush3.xpose.msra.mxu1 %v4708_v2 }
 0x2ab   :  { %3497 = vmatprep.subr.mxu0 %v3593_v18  ;;  %3528 = vmatprep.subr.mxu1 %v3593_v18 }
 0x2ae   :  { %3498 = vmatpush3.xpose.msra.mxu0 %v2148_v10  ;;  %3529 = vmatpush3.xpose.msra.mxu1 %v4722_v61 }
 0x2af   :  { %3499 = vmatprep.subr.mxu0 %v3593_v18  ;;  %3530 = vmatprep.subr.mxu1 %v3593_v18 }
 0x2b2   :  { %3500 = vmatpush3.xpose.msra.mxu0 %v2155_v63  ;;  %3531 = vmatpush3.xpose.msra.mxu1 %v4736_v7 }
 0x2b3   :  { %3532 = vmatprep.subr.mxu1 %v3593_v18 }
 0x2b5   :  { %v3293_v19 = vpop.f32.mrf.mxu0  ;;  %3502 = vmatmul.mubr.f32.vlgmr.msra.gmra.mxu0 %v3595_v62 }
 0x2b6   :  { %v1843_v57 = vadd.f32 %v3293_v19, %v1718_v56  ;;  %3533 = vmatpush3.xpose.msra.mxu1 %v4748_v13 }
 0x2b7   :  { %v1836_v45 = vpop.f32.mrf.mxu0  ;;  %3534 = vmatprep.subr.mxu1 %v3593_v18 }
 0x2b8   :  { %v1837_v43 = vadd.f32 %v1836_v45, %v1710_v59 }
 0x2ba   :  { %3535 = vmatpush3.xpose.msra.mxu1 %v4760_v4 }
 0x2bd   :  { %v3328_v49 = vpop.f32.mrf.mxu1  ;;  %3537 = vmatmul.mubr.f32.vlgmr.msra.gmra.mxu1 %v3595_v62 }
 0x2be   :  { %v1936_v24 = vadd.f32 %v3328_v49, %v1843_v57 }
 0x2bf   :  { %v1929_v0 = vpop.f32.mrf.mxu1 }
 0x2c0   :  { %v1930_v53 = vadd.f32 %v1929_v0, %v1837_v43 }
 0x2f5   :  { %v2043_v23 = vpop.f32.mrf.mxu0 }
 0x2f7   :  { %v3363_v40 = vpop.f32.mrf.mxu0 }
 0x2fd   :  { %v2193_v9 = vpop.f32.mrf.mxu1 }
 0x2fe   :  { %v2194_v16 = vadd.f32 %v2193_v9, %v2043_v23 }
 0x2ff   :  { %v3398_v41 = vpop.f32.mrf.mxu1 }
 0x300   :  { %3559 = shalt.err (!%p3556_p4)
}
 0x301   :  { %s3597_s28 = smov 128   ;;  %s3598_s29 = smov 8   ;;  %v2593_v28 = vlaneseq  ;;  %v1942_v30 = vpop.xlane.xlu0 %1941  ;;  %v2590_v54 = vmul.f32 2.0, %v1936_v24  ;;  %v2589_v42 = vmul.f32 2.0, %v1930_v53 }
 0x302   :  { %2624 = dma.vmem_to_hbm [thread:$0]  %s2619_s0, 2048, %s4969_s4, [#allocation6], %s3597_s28, %s3597_s28, %s3598_s29  }
 0x303   :  { %v2594_v29 = vshrl.u32 %v2593_v28, 7  ;;  %s3599_s4 = smov [#allocation3]   ;;  %v2591_v8 = vsub.f32 %v2589_v42, %v1942_v30 }
 0x304   :  { %s2606_s6 = sshll.u32 %s3599_s4, 4  ;;  %s2607_s6 = int_to_ptr.vmem [resolvable:$true] %s2606_s6 }
 0x305   :  { %v2595_v6 = vsub.s32 0, %v2594_v29  ;;  %v1944_v2 = vpop.xlane.xlu0 %1943  ;;  %s3568_s7 = scalar_lea.vmem %s2607_s6, 256  ;;  %p3573_p6 = scmp.lt.s32.totalorder %s2607_s6, %s2607_s6 }
 0x306   :  { %v2592_v46 = vsub.f32 %v2590_v54, %v1944_v2  ;;  %p3569_p5 = scmp.ne.s32.totalorder %s2607_s6, %s3568_s7  ;;  %p3574_p7 = scmp.lt.s32.totalorder %s3568_s7, %s3568_s7 }
 0x308   :  { %p3575_p8 = por %p3574_p7, %p3573_p6 }
 0x30a   :  { %p3576_p9 = pnand %p3575_p8, %p3569_p5 }
 0x335   :  { %v2295_v18 = vpop.f32.mrf.mxu0 }
 0x336   :  { %v2296_v47 = vadd.f32 %v2295_v18, %v2194_v16 }
 0x337   :  { %v3433_v38 = vpop.f32.mrf.mxu0 }
 0x33d   :  { %v2381_v27 = vpop.f32.mrf.mxu1 }
 0x33e   :  { %v2382_v11 = vadd.f32 %v2381_v27, %v2296_v47 }
 0x33f   :  { %v3468_v25 = vpop.f32.mrf.mxu1 }
 0x375   :  { %v2499_v35 = vpop.f32.mrf.mxu0 }
 0x376   :  { %v2500_v31 = vadd.f32 %v2499_v35, %v2382_v11 }
 0x377   :  { %v3503_v32 = vpop.f32.mrf.mxu0 }
 0x37d   :  { %v2585_v33 = vpop.f32.mrf.mxu1 }
 0x37e   :  { %v2586_v26 = vadd.f32 %v2585_v33, %v2500_v31 }
 0x37f   :  { %v3538_v61 = vpop.f32.mrf.mxu1 }
 0x380   :  { %v2596_v7 = vrot.slane %v2586_v26, %v2595_v6 }
 0x382   :  { %v2597_v20 = vsub.f32 %v2591_v8, %v2596_v7  ;;  %v2598_v3 = vsub.f32 %v2592_v46, %v2596_v7 }
 0x384   :  { %2599 = vst [vmem:[#allocation3] sm:$0xff] %v2597_v20  ;;  %2600 = vst [vmem:[#allocation3 + $0x8] sm:$0xff] %v2598_v3 }
 0x385   :  { %3579 = shalt.err (!%p3576_p9)
}
 0x386   :  { %2612 = dma.vmem_to_hbm [thread:$0]  %s2607_s6, 256, %s4968_s3, [#allocation4], %s3597_s28, %s3597_s28, %s3598_s29  }
 0x387   :  { %3588 = dma.done.wait [#allocation4], 256  }
 0x388   :  { %3589 = vsyncadd [#allocation4], 4294967040 }
 0x389   :  { %3590 = dma.done.wait [#allocation6], 2048  }
 0x38a   :  { %3591 = vsyncadd [#allocation6], 4294965248 }
 0x38b   :  { %2631 = vsyncpa [#allocation4], 1 }
 0x38c   :  { %2632 = vsyncpa [#allocation6], 1 }

</bundles_post_ra>
